<compile_context>
chip_gen: v7x
topology: tpu7x:2x2x1
jax: 0.10.0
libtpu: 0.0.40
codegen_flags: <defaults>
</compile_context>

<pallas_src>
import functools
import math

import jax
import jax.numpy as jnp
from jax.experimental import pallas as pl
from jax.experimental.pallas import tpu as pltpu

# DTCWT level-1 'near_sym_a' biorthogonal (5,7)-tap analysis filters.
# (symmetric, so conv == correlation; global sign of h1o is irrelevant since
# only bandpass magnitudes are used)
H0O = (-0.05, 0.25, 0.5, 0.25, -0.05)
H1O = (-0.0107142857142857, 0.0535714285714286, 0.2607142857142857,
       -0.6071428571428571, 0.2607142857142857, 0.0535714285714286,
       -0.0107142857142857)
MAGBIAS = 0.01
_INV_SQRT2 = 1.0 / math.sqrt(2.0)


def _pfilter(ph0, ph1, taps, base, out_len, axis):
    """out[..j..] = sum_k taps[k] * X[.. 2*j + base + k ..] along `axis`,
    where X's even / odd samples along that axis are ph0 / ph1.
    Polyphase FIR: only unit-stride static slices of already-loaded values."""
    acc = None
    for k, t in enumerate(taps):
        p = base + k
        src = ph0 if (p % 2 == 0) else ph1
        idx = [slice(None)] * src.ndim
        idx[axis] = slice(p // 2, p // 2 + out_len)
        term = t * src[tuple(idx)]
        acc = term if acc is None else acc + term
    return acc


def _scat_fused_kernel(xp_ref, z_ref, *, Hs, Ws, magbias):
    """Fused near_sym_a level-1 DTCWT + q2c-magnitude scattering.

    xp_ref: (1, 4, Ct, Hs+3, Ws+3)  2x2 polyphase (phase = 2*row_par + col_par)
            of the symmetric-padded input, NCHW layout, W on lanes.
    z_ref:  (1, 7, Ct, Hs, Ws)      groups [ll, 15, 45, 75, 105, 135, 165].
    """
    # four input phases, each (Ct, Hs+3, Ws+3); loaded once.
    x = [[xp_ref[0, 2 * rp + cp] for cp in range(2)] for rp in range(2)]

    # ---- Row filtering (lane axis). lo/hi[src_row_parity][out_col_parity],
    # each (Ct, Hs+3, Ws). Shifts are static slices of in-register values.
    lo = [[None, None] for _ in range(2)]
    hi = [[None, None] for _ in range(2)]
    for rp in range(2):
        xe, xo = x[rp][0], x[rp][1]
        for ci in range(2):
            lo[rp][ci] = _pfilter(xe, xo, H0O, ci + 1, Ws, axis=2)
            hi[rp][ci] = _pfilter(xe, xo, H1O, ci, Ws, axis=2)

    # ---- Column filtering (sublane axis) straight into the four q2c phases
    # a=(even,even) b=(even,odd) c=(odd,even) d=(odd,odd); each (Ct, Hs, Ws).
    # Row-filtered strips lo/hi stay live and are reused across all taps.
    def col(src, taps, off):
        return [[_pfilter(src[0][ci], src[1][ci], taps, ri + off, Hs, axis=1)
                 for ci in range(2)] for ri in range(2)]

    llp = col(lo, H0O, 1)
    lhp = col(lo, H1O, 0)
    hlp = col(hi, H0O, 1)
    hhp = col(hi, H1O, 0)

    # Lowpass group: 2x2 average pool of ll.
    z_ref[0, 0] = 0.25 * (llp[0][0] + llp[0][1] + llp[1][0] + llp[1][1])

    # Bandpass groups: q2c + smoothed de-biased magnitude sqrt(r^2+i^2+b^2)-b.
    b2 = magbias * magbias

    def mags(ph, g1, g2):
        a, b, c, d = ph[0][0], ph[0][1], ph[1][0], ph[1][1]
        r1, i1 = (a - d) * _INV_SQRT2, (b + c) * _INV_SQRT2
        r2, i2 = (a + d) * _INV_SQRT2, (b - c) * _INV_SQRT2
        z_ref[0, g1] = jnp.sqrt(r1 * r1 + i1 * i1 + b2) - magbias
        z_ref[0, g2] = jnp.sqrt(r2 * r2 + i2 * i2 + b2) - magbias

    mags(lhp, 1, 6)   # 15, 165 deg
    mags(hlp, 3, 4)   # 75, 105 deg
    mags(hhp, 2, 5)   # 45, 135 deg


def _pick_block_channels(C, Hs, Ws, n_batch):
    """Largest channel tile whose per-block working set stays a few MiB, while
    keeping enough grid steps for pipelining / megacore load balance."""
    per_ch = 64 * Hs * Ws * 4            # rough live bytes per channel
    budget = 6 * 1024 * 1024
    ct = int(max(1, min(C, budget // max(per_ch, 1))))
    while C % ct:
        ct -= 1
    while ct > 1 and n_batch * (C // ct) < 8:
        ct -= 1
        while C % ct:
            ct -= 1
    return ct


def scat_layer_j1(x, magbias=MAGBIAS, block_channels=None):
    """ScatLayerj1 forward. x: (N, C, H, W) -> (N, 7*C, H/2, W/2) float32."""
    N, C, H, W = x.shape
    # replicate last row / col for odd sizes (same as the torch module)
    if H % 2 != 0:
        x = jnp.concatenate([x, x[:, :, -1:]], axis=2)
        H += 1
    if W % 2 != 0:
        x = jnp.concatenate([x, x[:, :, :, -1:]], axis=3)
        W += 1
    x = x.astype(jnp.float32)
    Hs, Ws = H // 2, W // 2
    Hp, Wp = Hs + 3, Ws + 3

    # symmetric (half-sample) pad by 3 and 2x2 polyphase split.  This is the
    # only XLA glue and touches only the input-sized tensor once.
    xp = jnp.pad(x, ((0, 0), (0, 0), (3, 3), (3, 3)), mode='symmetric')
    xph = xp.reshape(N, C, Hp, 2, Wp, 2).transpose(0, 3, 5, 1, 2, 4)
    xph = xph.reshape(N, 4, C, Hp, Wp)        # phase = 2*row_par + col_par

    Ct = block_channels or _pick_block_channels(C, Hs, Ws, N)

    Z = pl.pallas_call(
        functools.partial(_scat_fused_kernel, Hs=Hs, Ws=Ws, magbias=magbias),
        out_shape=jax.ShapeDtypeStruct((N, 7, C, Hs, Ws), jnp.float32),
        grid=(N, C // Ct),
        in_specs=[pl.BlockSpec((1, 4, Ct, Hp, Wp),
                               lambda n, c: (n, 0, c, 0, 0))],
        out_specs=pl.BlockSpec((1, 7, Ct, Hs, Ws),
                               lambda n, c: (n, 0, c, 0, 0)),
        compiler_params=pltpu.CompilerParams(
            dimension_semantics=("parallel", "parallel"),
            vmem_limit_bytes=32 * 1024 * 1024),
    )(xph)
    # free reshape to the torch (N, 7*C, Hs, Ws) channel layout
    return Z.reshape(N, 7 * C, Hs, Ws)


def _scat_layer_j1_ref(x, magbias=MAGBIAS):
    """Plain-jnp full-resolution reference (correctness check only)."""
    N, C, H, W = x.shape
    xp = jnp.pad(x.astype(jnp.float32), ((0, 0), (0, 0), (3, 3), (3, 3)),
                 mode='symmetric')
    lo = sum(t * xp[:, :, :, k + 1:k + 1 + W] for k, t in enumerate(H0O))
    hi = sum(t * xp[:, :, :, k:k + W] for k, t in enumerate(H1O))
    ll = sum(t * lo[:, :, k + 1:k + 1 + H, :] for k, t in enumerate(H0O))
    lh = sum(t * lo[:, :, k:k + H, :] for k, t in enumerate(H1O))
    hl = sum(t * hi[:, :, k + 1:k + 1 + H, :] for k, t in enumerate(H0O))
    hh = sum(t * hi[:, :, k:k + H, :] for k, t in enumerate(H1O))

    def q2c(y):
        a, b = y[:, :, 0::2, 0::2], y[:, :, 0::2, 1::2]
        c, d = y[:, :, 1::2, 0::2], y[:, :, 1::2, 1::2]
        s = _INV_SQRT2
        return ((a - d) * s, (b + c) * s), ((a + d) * s, (b - c) * s)

    def mag(r, i):
        return jnp.sqrt(r * r + i * i + magbias * magbias) - magbias

    ll_ds = 0.25 * (ll[:, :, 0::2, 0::2] + ll[:, :, 0::2, 1::2]
                    + ll[:, :, 1::2, 0::2] + ll[:, :, 1::2, 1::2])
    (r15, i15), (r165, i165) = q2c(lh)
    (r75, i75), (r105, i105) = q2c(hl)
    (r45, i45), (r135, i135) = q2c(hh)
    Z = jnp.stack([ll_ds, mag(r15, i15), mag(r45, i45), mag(r75, i75),
                   mag(r105, i105), mag(r135, i135), mag(r165, i165)], axis=1)
    return Z.reshape(N, 7 * C, H // 2, W // 2)


if __name__ == "__main__":
    key = jax.random.PRNGKey(0)
    N, C, H, W = 2, 4, 16, 16
    x = jax.random.normal(key, (N, C, H, W), jnp.float32)

    fwd = jax.jit(scat_layer_j1)
    z = jax.block_until_ready(fwd(x))

    assert z.shape == (N, 7 * C, H // 2, W // 2), z.shape
    assert z.dtype == jnp.float32
    assert bool(jnp.all(jnp.isfinite(z)))

    z_ref = _scat_layer_j1_ref(x)
    err = float(jnp.max(jnp.abs(z - z_ref)))
    assert bool(jnp.allclose(z, z_ref, rtol=1e-5, atol=1e-5)), err

    print("KERNEL_OK")
</pallas_src>

<mosaic_0001>
module attributes {stable_mosaic.version = 11 : i64} {
  func.func @_scat_fused_kernel(%arg0: i32, %arg1: i32, %arg2: memref<1x4x1x11x11xf32, #tpu.memory_space<vmem>>, %arg3: memref<1x7x1x8x8xf32, #tpu.memory_space<vmem>>) attributes {dimension_semantics = [#tpu.dimension_semantics<parallel>, #tpu.dimension_semantics<parallel>], iteration_bounds = array<i64: 2, 4>, scalar_prefetch = 0 : i64, scratch_operands = 0 : i64, tpu.core_type = #tpu.core_type<tc>, window_params = [{transform_indices = @transform_0, window_bounds = array<i64: 1, 4, 1, 11, 11>}, {transform_indices = @transform_1, window_bounds = array<i64: 1, 7, 1, 8, 8>}]} {
    %c0 = arith.constant 0 : index
    %c0_0 = arith.constant 0 : index
    %c0_1 = arith.constant 0 : index
    %c0_2 = arith.constant 0 : index
    %c0_3 = arith.constant 0 : index
    %0 = vector.load %arg2[%c0, %c0_0, %c0_1, %c0_2, %c0_3] : memref<1x4x1x11x11xf32, #tpu.memory_space<vmem>>, vector<1x1x1x11x11xf32>
    %1 = vector.shape_cast %0 : vector<1x1x1x11x11xf32> to vector<1x11x11xf32>
    %c0_4 = arith.constant 0 : index
    %c1 = arith.constant 1 : index
    %c0_5 = arith.constant 0 : index
    %c0_6 = arith.constant 0 : index
    %c0_7 = arith.constant 0 : index
    %2 = vector.load %arg2[%c0_4, %c1, %c0_5, %c0_6, %c0_7] : memref<1x4x1x11x11xf32, #tpu.memory_space<vmem>>, vector<1x1x1x11x11xf32>
    %3 = vector.shape_cast %2 : vector<1x1x1x11x11xf32> to vector<1x11x11xf32>
    %c0_8 = arith.constant 0 : index
    %c2 = arith.constant 2 : index
    %c0_9 = arith.constant 0 : index
    %c0_10 = arith.constant 0 : index
    %c0_11 = arith.constant 0 : index
    %4 = vector.load %arg2[%c0_8, %c2, %c0_9, %c0_10, %c0_11] : memref<1x4x1x11x11xf32, #tpu.memory_space<vmem>>, vector<1x1x1x11x11xf32>
    %5 = vector.shape_cast %4 : vector<1x1x1x11x11xf32> to vector<1x11x11xf32>
    %c0_12 = arith.constant 0 : index
    %c3 = arith.constant 3 : index
    %c0_13 = arith.constant 0 : index
    %c0_14 = arith.constant 0 : index
    %c0_15 = arith.constant 0 : index
    %6 = vector.load %arg2[%c0_12, %c3, %c0_13, %c0_14, %c0_15] : memref<1x4x1x11x11xf32, #tpu.memory_space<vmem>>, vector<1x1x1x11x11xf32>
    %7 = vector.shape_cast %6 : vector<1x1x1x11x11xf32> to vector<1x11x11xf32>
    %8 = vector.extract_strided_slice %3 {offsets = [0, 0, 0], sizes = [1, 11, 8], strides = [1, 1, 1]} : vector<1x11x11xf32> to vector<1x11x8xf32>
    %cst = arith.constant -5.000000e-02 : f32
    %9 = vector.broadcast %cst : f32 to vector<1x11x8xf32>
    %10 = arith.mulf %9, %8 : vector<1x11x8xf32>
    %11 = vector.extract_strided_slice %1 {offsets = [0, 0, 1], sizes = [1, 11, 8], strides = [1, 1, 1]} : vector<1x11x11xf32> to vector<1x11x8xf32>
    %cst_16 = arith.constant 2.500000e-01 : f32
    %12 = vector.broadcast %cst_16 : f32 to vector<1x11x8xf32>
    %13 = arith.mulf %12, %11 : vector<1x11x8xf32>
    %14 = arith.addf %10, %13 : vector<1x11x8xf32>
    %15 = vector.extract_strided_slice %3 {offsets = [0, 0, 1], sizes = [1, 11, 8], strides = [1, 1, 1]} : vector<1x11x11xf32> to vector<1x11x8xf32>
    %cst_17 = arith.constant 5.000000e-01 : f32
    %16 = vector.broadcast %cst_17 : f32 to vector<1x11x8xf32>
    %17 = arith.mulf %16, %15 : vector<1x11x8xf32>
    %18 = arith.addf %14, %17 : vector<1x11x8xf32>
    %19 = vector.extract_strided_slice %1 {offsets = [0, 0, 2], sizes = [1, 11, 8], strides = [1, 1, 1]} : vector<1x11x11xf32> to vector<1x11x8xf32>
    %cst_18 = arith.constant 2.500000e-01 : f32
    %20 = vector.broadcast %cst_18 : f32 to vector<1x11x8xf32>
    %21 = arith.mulf %20, %19 : vector<1x11x8xf32>
    %22 = arith.addf %18, %21 : vector<1x11x8xf32>
    %23 = vector.extract_strided_slice %3 {offsets = [0, 0, 2], sizes = [1, 11, 8], strides = [1, 1, 1]} : vector<1x11x11xf32> to vector<1x11x8xf32>
    %cst_19 = arith.constant -5.000000e-02 : f32
    %24 = vector.broadcast %cst_19 : f32 to vector<1x11x8xf32>
    %25 = arith.mulf %24, %23 : vector<1x11x8xf32>
    %26 = arith.addf %22, %25 : vector<1x11x8xf32>
    %27 = vector.extract_strided_slice %1 {offsets = [0, 0, 0], sizes = [1, 11, 8], strides = [1, 1, 1]} : vector<1x11x11xf32> to vector<1x11x8xf32>
    %cst_20 = arith.constant -0.010714286 : f32
    %28 = vector.broadcast %cst_20 : f32 to vector<1x11x8xf32>
    %29 = arith.mulf %28, %27 : vector<1x11x8xf32>
    %30 = vector.extract_strided_slice %3 {offsets = [0, 0, 0], sizes = [1, 11, 8], strides = [1, 1, 1]} : vector<1x11x11xf32> to vector<1x11x8xf32>
    %cst_21 = arith.constant 0.0535714291 : f32
    %31 = vector.broadcast %cst_21 : f32 to vector<1x11x8xf32>
    %32 = arith.mulf %31, %30 : vector<1x11x8xf32>
    %33 = arith.addf %29, %32 : vector<1x11x8xf32>
    %34 = vector.extract_strided_slice %1 {offsets = [0, 0, 1], sizes = [1, 11, 8], strides = [1, 1, 1]} : vector<1x11x11xf32> to vector<1x11x8xf32>
    %cst_22 = arith.constant 0.260714293 : f32
    %35 = vector.broadcast %cst_22 : f32 to vector<1x11x8xf32>
    %36 = arith.mulf %35, %34 : vector<1x11x8xf32>
    %37 = arith.addf %33, %36 : vector<1x11x8xf32>
    %38 = vector.extract_strided_slice %3 {offsets = [0, 0, 1], sizes = [1, 11, 8], strides = [1, 1, 1]} : vector<1x11x11xf32> to vector<1x11x8xf32>
    %cst_23 = arith.constant -0.607142865 : f32
    %39 = vector.broadcast %cst_23 : f32 to vector<1x11x8xf32>
    %40 = arith.mulf %39, %38 : vector<1x11x8xf32>
    %41 = arith.addf %37, %40 : vector<1x11x8xf32>
    %42 = vector.extract_strided_slice %1 {offsets = [0, 0, 2], sizes = [1, 11, 8], strides = [1, 1, 1]} : vector<1x11x11xf32> to vector<1x11x8xf32>
    %cst_24 = arith.constant 0.260714293 : f32
    %43 = vector.broadcast %cst_24 : f32 to vector<1x11x8xf32>
    %44 = arith.mulf %43, %42 : vector<1x11x8xf32>
    %45 = arith.addf %41, %44 : vector<1x11x8xf32>
    %46 = vector.extract_strided_slice %3 {offsets = [0, 0, 2], sizes = [1, 11, 8], strides = [1, 1, 1]} : vector<1x11x11xf32> to vector<1x11x8xf32>
    %cst_25 = arith.constant 0.0535714291 : f32
    %47 = vector.broadcast %cst_25 : f32 to vector<1x11x8xf32>
    %48 = arith.mulf %47, %46 : vector<1x11x8xf32>
    %49 = arith.addf %45, %48 : vector<1x11x8xf32>
    %50 = vector.extract_strided_slice %1 {offsets = [0, 0, 3], sizes = [1, 11, 8], strides = [1, 1, 1]} : vector<1x11x11xf32> to vector<1x11x8xf32>
    %cst_26 = arith.constant -0.010714286 : f32
    %51 = vector.broadcast %cst_26 : f32 to vector<1x11x8xf32>
    %52 = arith.mulf %51, %50 : vector<1x11x8xf32>
    %53 = arith.addf %49, %52 : vector<1x11x8xf32>
    %54 = vector.extract_strided_slice %1 {offsets = [0, 0, 1], sizes = [1, 11, 8], strides = [1, 1, 1]} : vector<1x11x11xf32> to vector<1x11x8xf32>
    %cst_27 = arith.constant -5.000000e-02 : f32
    %55 = vector.broadcast %cst_27 : f32 to vector<1x11x8xf32>
    %56 = arith.mulf %55, %54 : vector<1x11x8xf32>
    %57 = vector.extract_strided_slice %3 {offsets = [0, 0, 1], sizes = [1, 11, 8], strides = [1, 1, 1]} : vector<1x11x11xf32> to vector<1x11x8xf32>
    %cst_28 = arith.constant 2.500000e-01 : f32
    %58 = vector.broadcast %cst_28 : f32 to vector<1x11x8xf32>
    %59 = arith.mulf %58, %57 : vector<1x11x8xf32>
    %60 = arith.addf %56, %59 : vector<1x11x8xf32>
    %61 = vector.extract_strided_slice %1 {offsets = [0, 0, 2], sizes = [1, 11, 8], strides = [1, 1, 1]} : vector<1x11x11xf32> to vector<1x11x8xf32>
    %cst_29 = arith.constant 5.000000e-01 : f32
    %62 = vector.broadcast %cst_29 : f32 to vector<1x11x8xf32>
    %63 = arith.mulf %62, %61 : vector<1x11x8xf32>
    %64 = arith.addf %60, %63 : vector<1x11x8xf32>
    %65 = vector.extract_strided_slice %3 {offsets = [0, 0, 2], sizes = [1, 11, 8], strides = [1, 1, 1]} : vector<1x11x11xf32> to vector<1x11x8xf32>
    %cst_30 = arith.constant 2.500000e-01 : f32
    %66 = vector.broadcast %cst_30 : f32 to vector<1x11x8xf32>
    %67 = arith.mulf %66, %65 : vector<1x11x8xf32>
    %68 = arith.addf %64, %67 : vector<1x11x8xf32>
    %69 = vector.extract_strided_slice %1 {offsets = [0, 0, 3], sizes = [1, 11, 8], strides = [1, 1, 1]} : vector<1x11x11xf32> to vector<1x11x8xf32>
    %cst_31 = arith.constant -5.000000e-02 : f32
    %70 = vector.broadcast %cst_31 : f32 to vector<1x11x8xf32>
    %71 = arith.mulf %70, %69 : vector<1x11x8xf32>
    %72 = arith.addf %68, %71 : vector<1x11x8xf32>
    %73 = vector.extract_strided_slice %3 {offsets = [0, 0, 0], sizes = [1, 11, 8], strides = [1, 1, 1]} : vector<1x11x11xf32> to vector<1x11x8xf32>
    %cst_32 = arith.constant -0.010714286 : f32
    %74 = vector.broadcast %cst_32 : f32 to vector<1x11x8xf32>
    %75 = arith.mulf %74, %73 : vector<1x11x8xf32>
    %76 = vector.extract_strided_slice %1 {offsets = [0, 0, 1], sizes = [1, 11, 8], strides = [1, 1, 1]} : vector<1x11x11xf32> to vector<1x11x8xf32>
    %cst_33 = arith.constant 0.0535714291 : f32
    %77 = vector.broadcast %cst_33 : f32 to vector<1x11x8xf32>
    %78 = arith.mulf %77, %76 : vector<1x11x8xf32>
    %79 = arith.addf %75, %78 : vector<1x11x8xf32>
    %80 = vector.extract_strided_slice %3 {offsets = [0, 0, 1], sizes = [1, 11, 8], strides = [1, 1, 1]} : vector<1x11x11xf32> to vector<1x11x8xf32>
    %cst_34 = arith.constant 0.260714293 : f32
    %81 = vector.broadcast %cst_34 : f32 to vector<1x11x8xf32>
    %82 = arith.mulf %81, %80 : vector<1x11x8xf32>
    %83 = arith.addf %79, %82 : vector<1x11x8xf32>
    %84 = vector.extract_strided_slice %1 {offsets = [0, 0, 2], sizes = [1, 11, 8], strides = [1, 1, 1]} : vector<1x11x11xf32> to vector<1x11x8xf32>
    %cst_35 = arith.constant -0.607142865 : f32
    %85 = vector.broadcast %cst_35 : f32 to vector<1x11x8xf32>
    %86 = arith.mulf %85, %84 : vector<1x11x8xf32>
    %87 = arith.addf %83, %86 : vector<1x11x8xf32>
    %88 = vector.extract_strided_slice %3 {offsets = [0, 0, 2], sizes = [1, 11, 8], strides = [1, 1, 1]} : vector<1x11x11xf32> to vector<1x11x8xf32>
    %cst_36 = arith.constant 0.260714293 : f32
    %89 = vector.broadcast %cst_36 : f32 to vector<1x11x8xf32>
    %90 = arith.mulf %89, %88 : vector<1x11x8xf32>
    %91 = arith.addf %87, %90 : vector<1x11x8xf32>
    %92 = vector.extract_strided_slice %1 {offsets = [0, 0, 3], sizes = [1, 11, 8], strides = [1, 1, 1]} : vector<1x11x11xf32> to vector<1x11x8xf32>
    %cst_37 = arith.constant 0.0535714291 : f32
    %93 = vector.broadcast %cst_37 : f32 to vector<1x11x8xf32>
    %94 = arith.mulf %93, %92 : vector<1x11x8xf32>
    %95 = arith.addf %91, %94 : vector<1x11x8xf32>
    %96 = vector.extract_strided_slice %3 {offsets = [0, 0, 3], sizes = [1, 11, 8], strides = [1, 1, 1]} : vector<1x11x11xf32> to vector<1x11x8xf32>
    %cst_38 = arith.constant -0.010714286 : f32
    %97 = vector.broadcast %cst_38 : f32 to vector<1x11x8xf32>
    %98 = arith.mulf %97, %96 : vector<1x11x8xf32>
    %99 = arith.addf %95, %98 : vector<1x11x8xf32>
    %100 = vector.extract_strided_slice %7 {offsets = [0, 0, 0], sizes = [1, 11, 8], strides = [1, 1, 1]} : vector<1x11x11xf32> to vector<1x11x8xf32>
    %cst_39 = arith.constant -5.000000e-02 : f32
    %101 = vector.broadcast %cst_39 : f32 to vector<1x11x8xf32>
    %102 = arith.mulf %101, %100 : vector<1x11x8xf32>
    %103 = vector.extract_strided_slice %5 {offsets = [0, 0, 1], sizes = [1, 11, 8], strides = [1, 1, 1]} : vector<1x11x11xf32> to vector<1x11x8xf32>
    %cst_40 = arith.constant 2.500000e-01 : f32
    %104 = vector.broadcast %cst_40 : f32 to vector<1x11x8xf32>
    %105 = arith.mulf %104, %103 : vector<1x11x8xf32>
    %106 = arith.addf %102, %105 : vector<1x11x8xf32>
    %107 = vector.extract_strided_slice %7 {offsets = [0, 0, 1], sizes = [1, 11, 8], strides = [1, 1, 1]} : vector<1x11x11xf32> to vector<1x11x8xf32>
    %cst_41 = arith.constant 5.000000e-01 : f32
    %108 = vector.broadcast %cst_41 : f32 to vector<1x11x8xf32>
    %109 = arith.mulf %108, %107 : vector<1x11x8xf32>
    %110 = arith.addf %106, %109 : vector<1x11x8xf32>
    %111 = vector.extract_strided_slice %5 {offsets = [0, 0, 2], sizes = [1, 11, 8], strides = [1, 1, 1]} : vector<1x11x11xf32> to vector<1x11x8xf32>
    %cst_42 = arith.constant 2.500000e-01 : f32
    %112 = vector.broadcast %cst_42 : f32 to vector<1x11x8xf32>
    %113 = arith.mulf %112, %111 : vector<1x11x8xf32>
    %114 = arith.addf %110, %113 : vector<1x11x8xf32>
    %115 = vector.extract_strided_slice %7 {offsets = [0, 0, 2], sizes = [1, 11, 8], strides = [1, 1, 1]} : vector<1x11x11xf32> to vector<1x11x8xf32>
    %cst_43 = arith.constant -5.000000e-02 : f32
    %116 = vector.broadcast %cst_43 : f32 to vector<1x11x8xf32>
    %117 = arith.mulf %116, %115 : vector<1x11x8xf32>
    %118 = arith.addf %114, %117 : vector<1x11x8xf32>
    %119 = vector.extract_strided_slice %5 {offsets = [0, 0, 0], sizes = [1, 11, 8], strides = [1, 1, 1]} : vector<1x11x11xf32> to vector<1x11x8xf32>
    %cst_44 = arith.constant -0.010714286 : f32
    %120 = vector.broadcast %cst_44 : f32 to vector<1x11x8xf32>
    %121 = arith.mulf %120, %119 : vector<1x11x8xf32>
    %122 = vector.extract_strided_slice %7 {offsets = [0, 0, 0], sizes = [1, 11, 8], strides = [1, 1, 1]} : vector<1x11x11xf32> to vector<1x11x8xf32>
    %cst_45 = arith.constant 0.0535714291 : f32
    %123 = vector.broadcast %cst_45 : f32 to vector<1x11x8xf32>
    %124 = arith.mulf %123, %122 : vector<1x11x8xf32>
    %125 = arith.addf %121, %124 : vector<1x11x8xf32>
    %126 = vector.extract_strided_slice %5 {offsets = [0, 0, 1], sizes = [1, 11, 8], strides = [1, 1, 1]} : vector<1x11x11xf32> to vector<1x11x8xf32>
    %cst_46 = arith.constant 0.260714293 : f32
    %127 = vector.broadcast %cst_46 : f32 to vector<1x11x8xf32>
    %128 = arith.mulf %127, %126 : vector<1x11x8xf32>
    %129 = arith.addf %125, %128 : vector<1x11x8xf32>
    %130 = vector.extract_strided_slice %7 {offsets = [0, 0, 1], sizes = [1, 11, 8], strides = [1, 1, 1]} : vector<1x11x11xf32> to vector<1x11x8xf32>
    %cst_47 = arith.constant -0.607142865 : f32
    %131 = vector.broadcast %cst_47 : f32 to vector<1x11x8xf32>
    %132 = arith.mulf %131, %130 : vector<1x11x8xf32>
    %133 = arith.addf %129, %132 : vector<1x11x8xf32>
    %134 = vector.extract_strided_slice %5 {offsets = [0, 0, 2], sizes = [1, 11, 8], strides = [1, 1, 1]} : vector<1x11x11xf32> to vector<1x11x8xf32>
    %cst_48 = arith.constant 0.260714293 : f32
    %135 = vector.broadcast %cst_48 : f32 to vector<1x11x8xf32>
    %136 = arith.mulf %135, %134 : vector<1x11x8xf32>
    %137 = arith.addf %133, %136 : vector<1x11x8xf32>
    %138 = vector.extract_strided_slice %7 {offsets = [0, 0, 2], sizes = [1, 11, 8], strides = [1, 1, 1]} : vector<1x11x11xf32> to vector<1x11x8xf32>
    %cst_49 = arith.constant 0.0535714291 : f32
    %139 = vector.broadcast %cst_49 : f32 to vector<1x11x8xf32>
    %140 = arith.mulf %139, %138 : vector<1x11x8xf32>
    %141 = arith.addf %137, %140 : vector<1x11x8xf32>
    %142 = vector.extract_strided_slice %5 {offsets = [0, 0, 3], sizes = [1, 11, 8], strides = [1, 1, 1]} : vector<1x11x11xf32> to vector<1x11x8xf32>
    %cst_50 = arith.constant -0.010714286 : f32
    %143 = vector.broadcast %cst_50 : f32 to vector<1x11x8xf32>
    %144 = arith.mulf %143, %142 : vector<1x11x8xf32>
    %145 = arith.addf %141, %144 : vector<1x11x8xf32>
    %146 = vector.extract_strided_slice %5 {offsets = [0, 0, 1], sizes = [1, 11, 8], strides = [1, 1, 1]} : vector<1x11x11xf32> to vector<1x11x8xf32>
    %cst_51 = arith.constant -5.000000e-02 : f32
    %147 = vector.broadcast %cst_51 : f32 to vector<1x11x8xf32>
    %148 = arith.mulf %147, %146 : vector<1x11x8xf32>
    %149 = vector.extract_strided_slice %7 {offsets = [0, 0, 1], sizes = [1, 11, 8], strides = [1, 1, 1]} : vector<1x11x11xf32> to vector<1x11x8xf32>
    %cst_52 = arith.constant 2.500000e-01 : f32
    %150 = vector.broadcast %cst_52 : f32 to vector<1x11x8xf32>
    %151 = arith.mulf %150, %149 : vector<1x11x8xf32>
    %152 = arith.addf %148, %151 : vector<1x11x8xf32>
    %153 = vector.extract_strided_slice %5 {offsets = [0, 0, 2], sizes = [1, 11, 8], strides = [1, 1, 1]} : vector<1x11x11xf32> to vector<1x11x8xf32>
    %cst_53 = arith.constant 5.000000e-01 : f32
    %154 = vector.broadcast %cst_53 : f32 to vector<1x11x8xf32>
    %155 = arith.mulf %154, %153 : vector<1x11x8xf32>
    %156 = arith.addf %152, %155 : vector<1x11x8xf32>
    %157 = vector.extract_strided_slice %7 {offsets = [0, 0, 2], sizes = [1, 11, 8], strides = [1, 1, 1]} : vector<1x11x11xf32> to vector<1x11x8xf32>
    %cst_54 = arith.constant 2.500000e-01 : f32
    %158 = vector.broadcast %cst_54 : f32 to vector<1x11x8xf32>
    %159 = arith.mulf %158, %157 : vector<1x11x8xf32>
    %160 = arith.addf %156, %159 : vector<1x11x8xf32>
    %161 = vector.extract_strided_slice %5 {offsets = [0, 0, 3], sizes = [1, 11, 8], strides = [1, 1, 1]} : vector<1x11x11xf32> to vector<1x11x8xf32>
    %cst_55 = arith.constant -5.000000e-02 : f32
    %162 = vector.broadcast %cst_55 : f32 to vector<1x11x8xf32>
    %163 = arith.mulf %162, %161 : vector<1x11x8xf32>
    %164 = arith.addf %160, %163 : vector<1x11x8xf32>
    %165 = vector.extract_strided_slice %7 {offsets = [0, 0, 0], sizes = [1, 11, 8], strides = [1, 1, 1]} : vector<1x11x11xf32> to vector<1x11x8xf32>
    %cst_56 = arith.constant -0.010714286 : f32
    %166 = vector.broadcast %cst_56 : f32 to vector<1x11x8xf32>
    %167 = arith.mulf %166, %165 : vector<1x11x8xf32>
    %168 = vector.extract_strided_slice %5 {offsets = [0, 0, 1], sizes = [1, 11, 8], strides = [1, 1, 1]} : vector<1x11x11xf32> to vector<1x11x8xf32>
    %cst_57 = arith.constant 0.0535714291 : f32
    %169 = vector.broadcast %cst_57 : f32 to vector<1x11x8xf32>
    %170 = arith.mulf %169, %168 : vector<1x11x8xf32>
    %171 = arith.addf %167, %170 : vector<1x11x8xf32>
    %172 = vector.extract_strided_slice %7 {offsets = [0, 0, 1], sizes = [1, 11, 8], strides = [1, 1, 1]} : vector<1x11x11xf32> to vector<1x11x8xf32>
    %cst_58 = arith.constant 0.260714293 : f32
    %173 = vector.broadcast %cst_58 : f32 to vector<1x11x8xf32>
    %174 = arith.mulf %173, %172 : vector<1x11x8xf32>
    %175 = arith.addf %171, %174 : vector<1x11x8xf32>
    %176 = vector.extract_strided_slice %5 {offsets = [0, 0, 2], sizes = [1, 11, 8], strides = [1, 1, 1]} : vector<1x11x11xf32> to vector<1x11x8xf32>
    %cst_59 = arith.constant -0.607142865 : f32
    %177 = vector.broadcast %cst_59 : f32 to vector<1x11x8xf32>
    %178 = arith.mulf %177, %176 : vector<1x11x8xf32>
    %179 = arith.addf %175, %178 : vector<1x11x8xf32>
    %180 = vector.extract_strided_slice %7 {offsets = [0, 0, 2], sizes = [1, 11, 8], strides = [1, 1, 1]} : vector<1x11x11xf32> to vector<1x11x8xf32>
    %cst_60 = arith.constant 0.260714293 : f32
    %181 = vector.broadcast %cst_60 : f32 to vector<1x11x8xf32>
    %182 = arith.mulf %181, %180 : vector<1x11x8xf32>
    %183 = arith.addf %179, %182 : vector<1x11x8xf32>
    %184 = vector.extract_strided_slice %5 {offsets = [0, 0, 3], sizes = [1, 11, 8], strides = [1, 1, 1]} : vector<1x11x11xf32> to vector<1x11x8xf32>
    %cst_61 = arith.constant 0.0535714291 : f32
    %185 = vector.broadcast %cst_61 : f32 to vector<1x11x8xf32>
    %186 = arith.mulf %185, %184 : vector<1x11x8xf32>
    %187 = arith.addf %183, %186 : vector<1x11x8xf32>
    %188 = vector.extract_strided_slice %7 {offsets = [0, 0, 3], sizes = [1, 11, 8], strides = [1, 1, 1]} : vector<1x11x11xf32> to vector<1x11x8xf32>
    %cst_62 = arith.constant -0.010714286 : f32
    %189 = vector.broadcast %cst_62 : f32 to vector<1x11x8xf32>
    %190 = arith.mulf %189, %188 : vector<1x11x8xf32>
    %191 = arith.addf %187, %190 : vector<1x11x8xf32>
    %192 = vector.extract_strided_slice %118 {offsets = [0, 0, 0], sizes = [1, 8, 8], strides = [1, 1, 1]} : vector<1x11x8xf32> to vector<1x8x8xf32>
    %cst_63 = arith.constant -5.000000e-02 : f32
    %193 = vector.broadcast %cst_63 : f32 to vector<1x8x8xf32>
    %194 = arith.mulf %193, %192 : vector<1x8x8xf32>
    %195 = vector.extract_strided_slice %26 {offsets = [0, 1, 0], sizes = [1, 8, 8], strides = [1, 1, 1]} : vector<1x11x8xf32> to vector<1x8x8xf32>
    %cst_64 = arith.constant 2.500000e-01 : f32
    %196 = vector.broadcast %cst_64 : f32 to vector<1x8x8xf32>
    %197 = arith.mulf %196, %195 : vector<1x8x8xf32>
    %198 = arith.addf %194, %197 : vector<1x8x8xf32>
    %199 = vector.extract_strided_slice %118 {offsets = [0, 1, 0], sizes = [1, 8, 8], strides = [1, 1, 1]} : vector<1x11x8xf32> to vector<1x8x8xf32>
    %cst_65 = arith.constant 5.000000e-01 : f32
    %200 = vector.broadcast %cst_65 : f32 to vector<1x8x8xf32>
    %201 = arith.mulf %200, %199 : vector<1x8x8xf32>
    %202 = arith.addf %198, %201 : vector<1x8x8xf32>
    %203 = vector.extract_strided_slice %26 {offsets = [0, 2, 0], sizes = [1, 8, 8], strides = [1, 1, 1]} : vector<1x11x8xf32> to vector<1x8x8xf32>
    %cst_66 = arith.constant 2.500000e-01 : f32
    %204 = vector.broadcast %cst_66 : f32 to vector<1x8x8xf32>
    %205 = arith.mulf %204, %203 : vector<1x8x8xf32>
    %206 = arith.addf %202, %205 : vector<1x8x8xf32>
    %207 = vector.extract_strided_slice %118 {offsets = [0, 2, 0], sizes = [1, 8, 8], strides = [1, 1, 1]} : vector<1x11x8xf32> to vector<1x8x8xf32>
    %cst_67 = arith.constant -5.000000e-02 : f32
    %208 = vector.broadcast %cst_67 : f32 to vector<1x8x8xf32>
    %209 = arith.mulf %208, %207 : vector<1x8x8xf32>
    %210 = arith.addf %206, %209 : vector<1x8x8xf32>
    %211 = vector.extract_strided_slice %164 {offsets = [0, 0, 0], sizes = [1, 8, 8], strides = [1, 1, 1]} : vector<1x11x8xf32> to vector<1x8x8xf32>
    %cst_68 = arith.constant -5.000000e-02 : f32
    %212 = vector.broadcast %cst_68 : f32 to vector<1x8x8xf32>
    %213 = arith.mulf %212, %211 : vector<1x8x8xf32>
    %214 = vector.extract_strided_slice %72 {offsets = [0, 1, 0], sizes = [1, 8, 8], strides = [1, 1, 1]} : vector<1x11x8xf32> to vector<1x8x8xf32>
    %cst_69 = arith.constant 2.500000e-01 : f32
    %215 = vector.broadcast %cst_69 : f32 to vector<1x8x8xf32>
    %216 = arith.mulf %215, %214 : vector<1x8x8xf32>
    %217 = arith.addf %213, %216 : vector<1x8x8xf32>
    %218 = vector.extract_strided_slice %164 {offsets = [0, 1, 0], sizes = [1, 8, 8], strides = [1, 1, 1]} : vector<1x11x8xf32> to vector<1x8x8xf32>
    %cst_70 = arith.constant 5.000000e-01 : f32
    %219 = vector.broadcast %cst_70 : f32 to vector<1x8x8xf32>
    %220 = arith.mulf %219, %218 : vector<1x8x8xf32>
    %221 = arith.addf %217, %220 : vector<1x8x8xf32>
    %222 = vector.extract_strided_slice %72 {offsets = [0, 2, 0], sizes = [1, 8, 8], strides = [1, 1, 1]} : vector<1x11x8xf32> to vector<1x8x8xf32>
    %cst_71 = arith.constant 2.500000e-01 : f32
    %223 = vector.broadcast %cst_71 : f32 to vector<1x8x8xf32>
    %224 = arith.mulf %223, %222 : vector<1x8x8xf32>
    %225 = arith.addf %221, %224 : vector<1x8x8xf32>
    %226 = vector.extract_strided_slice %164 {offsets = [0, 2, 0], sizes = [1, 8, 8], strides = [1, 1, 1]} : vector<1x11x8xf32> to vector<1x8x8xf32>
    %cst_72 = arith.constant -5.000000e-02 : f32
    %227 = vector.broadcast %cst_72 : f32 to vector<1x8x8xf32>
    %228 = arith.mulf %227, %226 : vector<1x8x8xf32>
    %229 = arith.addf %225, %228 : vector<1x8x8xf32>
    %230 = vector.extract_strided_slice %26 {offsets = [0, 1, 0], sizes = [1, 8, 8], strides = [1, 1, 1]} : vector<1x11x8xf32> to vector<1x8x8xf32>
    %cst_73 = arith.constant -5.000000e-02 : f32
    %231 = vector.broadcast %cst_73 : f32 to vector<1x8x8xf32>
    %232 = arith.mulf %231, %230 : vector<1x8x8xf32>
    %233 = vector.extract_strided_slice %118 {offsets = [0, 1, 0], sizes = [1, 8, 8], strides = [1, 1, 1]} : vector<1x11x8xf32> to vector<1x8x8xf32>
    %cst_74 = arith.constant 2.500000e-01 : f32
    %234 = vector.broadcast %cst_74 : f32 to vector<1x8x8xf32>
    %235 = arith.mulf %234, %233 : vector<1x8x8xf32>
    %236 = arith.addf %232, %235 : vector<1x8x8xf32>
    %237 = vector.extract_strided_slice %26 {offsets = [0, 2, 0], sizes = [1, 8, 8], strides = [1, 1, 1]} : vector<1x11x8xf32> to vector<1x8x8xf32>
    %cst_75 = arith.constant 5.000000e-01 : f32
    %238 = vector.broadcast %cst_75 : f32 to vector<1x8x8xf32>
    %239 = arith.mulf %238, %237 : vector<1x8x8xf32>
    %240 = arith.addf %236, %239 : vector<1x8x8xf32>
    %241 = vector.extract_strided_slice %118 {offsets = [0, 2, 0], sizes = [1, 8, 8], strides = [1, 1, 1]} : vector<1x11x8xf32> to vector<1x8x8xf32>
    %cst_76 = arith.constant 2.500000e-01 : f32
    %242 = vector.broadcast %cst_76 : f32 to vector<1x8x8xf32>
    %243 = arith.mulf %242, %241 : vector<1x8x8xf32>
    %244 = arith.addf %240, %243 : vector<1x8x8xf32>
    %245 = vector.extract_strided_slice %26 {offsets = [0, 3, 0], sizes = [1, 8, 8], strides = [1, 1, 1]} : vector<1x11x8xf32> to vector<1x8x8xf32>
    %cst_77 = arith.constant -5.000000e-02 : f32
    %246 = vector.broadcast %cst_77 : f32 to vector<1x8x8xf32>
    %247 = arith.mulf %246, %245 : vector<1x8x8xf32>
    %248 = arith.addf %244, %247 : vector<1x8x8xf32>
    %249 = vector.extract_strided_slice %72 {offsets = [0, 1, 0], sizes = [1, 8, 8], strides = [1, 1, 1]} : vector<1x11x8xf32> to vector<1x8x8xf32>
    %cst_78 = arith.constant -5.000000e-02 : f32
    %250 = vector.broadcast %cst_78 : f32 to vector<1x8x8xf32>
    %251 = arith.mulf %250, %249 : vector<1x8x8xf32>
    %252 = vector.extract_strided_slice %164 {offsets = [0, 1, 0], sizes = [1, 8, 8], strides = [1, 1, 1]} : vector<1x11x8xf32> to vector<1x8x8xf32>
    %cst_79 = arith.constant 2.500000e-01 : f32
    %253 = vector.broadcast %cst_79 : f32 to vector<1x8x8xf32>
    %254 = arith.mulf %253, %252 : vector<1x8x8xf32>
    %255 = arith.addf %251, %254 : vector<1x8x8xf32>
    %256 = vector.extract_strided_slice %72 {offsets = [0, 2, 0], sizes = [1, 8, 8], strides = [1, 1, 1]} : vector<1x11x8xf32> to vector<1x8x8xf32>
    %cst_80 = arith.constant 5.000000e-01 : f32
    %257 = vector.broadcast %cst_80 : f32 to vector<1x8x8xf32>
    %258 = arith.mulf %257, %256 : vector<1x8x8xf32>
    %259 = arith.addf %255, %258 : vector<1x8x8xf32>
    %260 = vector.extract_strided_slice %164 {offsets = [0, 2, 0], sizes = [1, 8, 8], strides = [1, 1, 1]} : vector<1x11x8xf32> to vector<1x8x8xf32>
    %cst_81 = arith.constant 2.500000e-01 : f32
    %261 = vector.broadcast %cst_81 : f32 to vector<1x8x8xf32>
    %262 = arith.mulf %261, %260 : vector<1x8x8xf32>
    %263 = arith.addf %259, %262 : vector<1x8x8xf32>
    %264 = vector.extract_strided_slice %72 {offsets = [0, 3, 0], sizes = [1, 8, 8], strides = [1, 1, 1]} : vector<1x11x8xf32> to vector<1x8x8xf32>
    %cst_82 = arith.constant -5.000000e-02 : f32
    %265 = vector.broadcast %cst_82 : f32 to vector<1x8x8xf32>
    %266 = arith.mulf %265, %264 : vector<1x8x8xf32>
    %267 = arith.addf %263, %266 : vector<1x8x8xf32>
    %268 = vector.extract_strided_slice %26 {offsets = [0, 0, 0], sizes = [1, 8, 8], strides = [1, 1, 1]} : vector<1x11x8xf32> to vector<1x8x8xf32>
    %cst_83 = arith.constant -0.010714286 : f32
    %269 = vector.broadcast %cst_83 : f32 to vector<1x8x8xf32>
    %270 = arith.mulf %269, %268 : vector<1x8x8xf32>
    %271 = vector.extract_strided_slice %118 {offsets = [0, 0, 0], sizes = [1, 8, 8], strides = [1, 1, 1]} : vector<1x11x8xf32> to vector<1x8x8xf32>
    %cst_84 = arith.constant 0.0535714291 : f32
    %272 = vector.broadcast %cst_84 : f32 to vector<1x8x8xf32>
    %273 = arith.mulf %272, %271 : vector<1x8x8xf32>
    %274 = arith.addf %270, %273 : vector<1x8x8xf32>
    %275 = vector.extract_strided_slice %26 {offsets = [0, 1, 0], sizes = [1, 8, 8], strides = [1, 1, 1]} : vector<1x11x8xf32> to vector<1x8x8xf32>
    %cst_85 = arith.constant 0.260714293 : f32
    %276 = vector.broadcast %cst_85 : f32 to vector<1x8x8xf32>
    %277 = arith.mulf %276, %275 : vector<1x8x8xf32>
    %278 = arith.addf %274, %277 : vector<1x8x8xf32>
    %279 = vector.extract_strided_slice %118 {offsets = [0, 1, 0], sizes = [1, 8, 8], strides = [1, 1, 1]} : vector<1x11x8xf32> to vector<1x8x8xf32>
    %cst_86 = arith.constant -0.607142865 : f32
    %280 = vector.broadcast %cst_86 : f32 to vector<1x8x8xf32>
    %281 = arith.mulf %280, %279 : vector<1x8x8xf32>
    %282 = arith.addf %278, %281 : vector<1x8x8xf32>
    %283 = vector.extract_strided_slice %26 {offsets = [0, 2, 0], sizes = [1, 8, 8], strides = [1, 1, 1]} : vector<1x11x8xf32> to vector<1x8x8xf32>
    %cst_87 = arith.constant 0.260714293 : f32
    %284 = vector.broadcast %cst_87 : f32 to vector<1x8x8xf32>
    %285 = arith.mulf %284, %283 : vector<1x8x8xf32>
    %286 = arith.addf %282, %285 : vector<1x8x8xf32>
    %287 = vector.extract_strided_slice %118 {offsets = [0, 2, 0], sizes = [1, 8, 8], strides = [1, 1, 1]} : vector<1x11x8xf32> to vector<1x8x8xf32>
    %cst_88 = arith.constant 0.0535714291 : f32
    %288 = vector.broadcast %cst_88 : f32 to vector<1x8x8xf32>
    %289 = arith.mulf %288, %287 : vector<1x8x8xf32>
    %290 = arith.addf %286, %289 : vector<1x8x8xf32>
    %291 = vector.extract_strided_slice %26 {offsets = [0, 3, 0], sizes = [1, 8, 8], strides = [1, 1, 1]} : vector<1x11x8xf32> to vector<1x8x8xf32>
    %cst_89 = arith.constant -0.010714286 : f32
    %292 = vector.broadcast %cst_89 : f32 to vector<1x8x8xf32>
    %293 = arith.mulf %292, %291 : vector<1x8x8xf32>
    %294 = arith.addf %290, %293 : vector<1x8x8xf32>
    %295 = vector.extract_strided_slice %72 {offsets = [0, 0, 0], sizes = [1, 8, 8], strides = [1, 1, 1]} : vector<1x11x8xf32> to vector<1x8x8xf32>
    %cst_90 = arith.constant -0.010714286 : f32
    %296 = vector.broadcast %cst_90 : f32 to vector<1x8x8xf32>
    %297 = arith.mulf %296, %295 : vector<1x8x8xf32>
    %298 = vector.extract_strided_slice %164 {offsets = [0, 0, 0], sizes = [1, 8, 8], strides = [1, 1, 1]} : vector<1x11x8xf32> to vector<1x8x8xf32>
    %cst_91 = arith.constant 0.0535714291 : f32
    %299 = vector.broadcast %cst_91 : f32 to vector<1x8x8xf32>
    %300 = arith.mulf %299, %298 : vector<1x8x8xf32>
    %301 = arith.addf %297, %300 : vector<1x8x8xf32>
    %302 = vector.extract_strided_slice %72 {offsets = [0, 1, 0], sizes = [1, 8, 8], strides = [1, 1, 1]} : vector<1x11x8xf32> to vector<1x8x8xf32>
    %cst_92 = arith.constant 0.260714293 : f32
    %303 = vector.broadcast %cst_92 : f32 to vector<1x8x8xf32>
    %304 = arith.mulf %303, %302 : vector<1x8x8xf32>
    %305 = arith.addf %301, %304 : vector<1x8x8xf32>
    %306 = vector.extract_strided_slice %164 {offsets = [0, 1, 0], sizes = [1, 8, 8], strides = [1, 1, 1]} : vector<1x11x8xf32> to vector<1x8x8xf32>
    %cst_93 = arith.constant -0.607142865 : f32
    %307 = vector.broadcast %cst_93 : f32 to vector<1x8x8xf32>
    %308 = arith.mulf %307, %306 : vector<1x8x8xf32>
    %309 = arith.addf %305, %308 : vector<1x8x8xf32>
    %310 = vector.extract_strided_slice %72 {offsets = [0, 2, 0], sizes = [1, 8, 8], strides = [1, 1, 1]} : vector<1x11x8xf32> to vector<1x8x8xf32>
    %cst_94 = arith.constant 0.260714293 : f32
    %311 = vector.broadcast %cst_94 : f32 to vector<1x8x8xf32>
    %312 = arith.mulf %311, %310 : vector<1x8x8xf32>
    %313 = arith.addf %309, %312 : vector<1x8x8xf32>
    %314 = vector.extract_strided_slice %164 {offsets = [0, 2, 0], sizes = [1, 8, 8], strides = [1, 1, 1]} : vector<1x11x8xf32> to vector<1x8x8xf32>
    %cst_95 = arith.constant 0.0535714291 : f32
    %315 = vector.broadcast %cst_95 : f32 to vector<1x8x8xf32>
    %316 = arith.mulf %315, %314 : vector<1x8x8xf32>
    %317 = arith.addf %313, %316 : vector<1x8x8xf32>
    %318 = vector.extract_strided_slice %72 {offsets = [0, 3, 0], sizes = [1, 8, 8], strides = [1, 1, 1]} : vector<1x11x8xf32> to vector<1x8x8xf32>
    %cst_96 = arith.constant -0.010714286 : f32
    %319 = vector.broadcast %cst_96 : f32 to vector<1x8x8xf32>
    %320 = arith.mulf %319, %318 : vector<1x8x8xf32>
    %321 = arith.addf %317, %320 : vector<1x8x8xf32>
    %322 = vector.extract_strided_slice %118 {offsets = [0, 0, 0], sizes = [1, 8, 8], strides = [1, 1, 1]} : vector<1x11x8xf32> to vector<1x8x8xf32>
    %cst_97 = arith.constant -0.010714286 : f32
    %323 = vector.broadcast %cst_97 : f32 to vector<1x8x8xf32>
    %324 = arith.mulf %323, %322 : vector<1x8x8xf32>
    %325 = vector.extract_strided_slice %26 {offsets = [0, 1, 0], sizes = [1, 8, 8], strides = [1, 1, 1]} : vector<1x11x8xf32> to vector<1x8x8xf32>
    %cst_98 = arith.constant 0.0535714291 : f32
    %326 = vector.broadcast %cst_98 : f32 to vector<1x8x8xf32>
    %327 = arith.mulf %326, %325 : vector<1x8x8xf32>
    %328 = arith.addf %324, %327 : vector<1x8x8xf32>
    %329 = vector.extract_strided_slice %118 {offsets = [0, 1, 0], sizes = [1, 8, 8], strides = [1, 1, 1]} : vector<1x11x8xf32> to vector<1x8x8xf32>
    %cst_99 = arith.constant 0.260714293 : f32
    %330 = vector.broadcast %cst_99 : f32 to vector<1x8x8xf32>
    %331 = arith.mulf %330, %329 : vector<1x8x8xf32>
    %332 = arith.addf %328, %331 : vector<1x8x8xf32>
    %333 = vector.extract_strided_slice %26 {offsets = [0, 2, 0], sizes = [1, 8, 8], strides = [1, 1, 1]} : vector<1x11x8xf32> to vector<1x8x8xf32>
    %cst_100 = arith.constant -0.607142865 : f32
    %334 = vector.broadcast %cst_100 : f32 to vector<1x8x8xf32>
    %335 = arith.mulf %334, %333 : vector<1x8x8xf32>
    %336 = arith.addf %332, %335 : vector<1x8x8xf32>
    %337 = vector.extract_strided_slice %118 {offsets = [0, 2, 0], sizes = [1, 8, 8], strides = [1, 1, 1]} : vector<1x11x8xf32> to vector<1x8x8xf32>
    %cst_101 = arith.constant 0.260714293 : f32
    %338 = vector.broadcast %cst_101 : f32 to vector<1x8x8xf32>
    %339 = arith.mulf %338, %337 : vector<1x8x8xf32>
    %340 = arith.addf %336, %339 : vector<1x8x8xf32>
    %341 = vector.extract_strided_slice %26 {offsets = [0, 3, 0], sizes = [1, 8, 8], strides = [1, 1, 1]} : vector<1x11x8xf32> to vector<1x8x8xf32>
    %cst_102 = arith.constant 0.0535714291 : f32
    %342 = vector.broadcast %cst_102 : f32 to vector<1x8x8xf32>
    %343 = arith.mulf %342, %341 : vector<1x8x8xf32>
    %344 = arith.addf %340, %343 : vector<1x8x8xf32>
    %345 = vector.extract_strided_slice %118 {offsets = [0, 3, 0], sizes = [1, 8, 8], strides = [1, 1, 1]} : vector<1x11x8xf32> to vector<1x8x8xf32>
    %cst_103 = arith.constant -0.010714286 : f32
    %346 = vector.broadcast %cst_103 : f32 to vector<1x8x8xf32>
    %347 = arith.mulf %346, %345 : vector<1x8x8xf32>
    %348 = arith.addf %344, %347 : vector<1x8x8xf32>
    %349 = vector.extract_strided_slice %164 {offsets = [0, 0, 0], sizes = [1, 8, 8], strides = [1, 1, 1]} : vector<1x11x8xf32> to vector<1x8x8xf32>
    %cst_104 = arith.constant -0.010714286 : f32
    %350 = vector.broadcast %cst_104 : f32 to vector<1x8x8xf32>
    %351 = arith.mulf %350, %349 : vector<1x8x8xf32>
    %352 = vector.extract_strided_slice %72 {offsets = [0, 1, 0], sizes = [1, 8, 8], strides = [1, 1, 1]} : vector<1x11x8xf32> to vector<1x8x8xf32>
    %cst_105 = arith.constant 0.0535714291 : f32
    %353 = vector.broadcast %cst_105 : f32 to vector<1x8x8xf32>
    %354 = arith.mulf %353, %352 : vector<1x8x8xf32>
    %355 = arith.addf %351, %354 : vector<1x8x8xf32>
    %356 = vector.extract_strided_slice %164 {offsets = [0, 1, 0], sizes = [1, 8, 8], strides = [1, 1, 1]} : vector<1x11x8xf32> to vector<1x8x8xf32>
    %cst_106 = arith.constant 0.260714293 : f32
    %357 = vector.broadcast %cst_106 : f32 to vector<1x8x8xf32>
    %358 = arith.mulf %357, %356 : vector<1x8x8xf32>
    %359 = arith.addf %355, %358 : vector<1x8x8xf32>
    %360 = vector.extract_strided_slice %72 {offsets = [0, 2, 0], sizes = [1, 8, 8], strides = [1, 1, 1]} : vector<1x11x8xf32> to vector<1x8x8xf32>
    %cst_107 = arith.constant -0.607142865 : f32
    %361 = vector.broadcast %cst_107 : f32 to vector<1x8x8xf32>
    %362 = arith.mulf %361, %360 : vector<1x8x8xf32>
    %363 = arith.addf %359, %362 : vector<1x8x8xf32>
    %364 = vector.extract_strided_slice %164 {offsets = [0, 2, 0], sizes = [1, 8, 8], strides = [1, 1, 1]} : vector<1x11x8xf32> to vector<1x8x8xf32>
    %cst_108 = arith.constant 0.260714293 : f32
    %365 = vector.broadcast %cst_108 : f32 to vector<1x8x8xf32>
    %366 = arith.mulf %365, %364 : vector<1x8x8xf32>
    %367 = arith.addf %363, %366 : vector<1x8x8xf32>
    %368 = vector.extract_strided_slice %72 {offsets = [0, 3, 0], sizes = [1, 8, 8], strides = [1, 1, 1]} : vector<1x11x8xf32> to vector<1x8x8xf32>
    %cst_109 = arith.constant 0.0535714291 : f32
    %369 = vector.broadcast %cst_109 : f32 to vector<1x8x8xf32>
    %370 = arith.mulf %369, %368 : vector<1x8x8xf32>
    %371 = arith.addf %367, %370 : vector<1x8x8xf32>
    %372 = vector.extract_strided_slice %164 {offsets = [0, 3, 0], sizes = [1, 8, 8], strides = [1, 1, 1]} : vector<1x11x8xf32> to vector<1x8x8xf32>
    %cst_110 = arith.constant -0.010714286 : f32
    %373 = vector.broadcast %cst_110 : f32 to vector<1x8x8xf32>
    %374 = arith.mulf %373, %372 : vector<1x8x8xf32>
    %375 = arith.addf %371, %374 : vector<1x8x8xf32>
    %376 = vector.extract_strided_slice %145 {offsets = [0, 0, 0], sizes = [1, 8, 8], strides = [1, 1, 1]} : vector<1x11x8xf32> to vector<1x8x8xf32>
    %cst_111 = arith.constant -5.000000e-02 : f32
    %377 = vector.broadcast %cst_111 : f32 to vector<1x8x8xf32>
    %378 = arith.mulf %377, %376 : vector<1x8x8xf32>
    %379 = vector.extract_strided_slice %53 {offsets = [0, 1, 0], sizes = [1, 8, 8], strides = [1, 1, 1]} : vector<1x11x8xf32> to vector<1x8x8xf32>
    %cst_112 = arith.constant 2.500000e-01 : f32
    %380 = vector.broadcast %cst_112 : f32 to vector<1x8x8xf32>
    %381 = arith.mulf %380, %379 : vector<1x8x8xf32>
    %382 = arith.addf %378, %381 : vector<1x8x8xf32>
    %383 = vector.extract_strided_slice %145 {offsets = [0, 1, 0], sizes = [1, 8, 8], strides = [1, 1, 1]} : vector<1x11x8xf32> to vector<1x8x8xf32>
    %cst_113 = arith.constant 5.000000e-01 : f32
    %384 = vector.broadcast %cst_113 : f32 to vector<1x8x8xf32>
    %385 = arith.mulf %384, %383 : vector<1x8x8xf32>
    %386 = arith.addf %382, %385 : vector<1x8x8xf32>
    %387 = vector.extract_strided_slice %53 {offsets = [0, 2, 0], sizes = [1, 8, 8], strides = [1, 1, 1]} : vector<1x11x8xf32> to vector<1x8x8xf32>
    %cst_114 = arith.constant 2.500000e-01 : f32
    %388 = vector.broadcast %cst_114 : f32 to vector<1x8x8xf32>
    %389 = arith.mulf %388, %387 : vector<1x8x8xf32>
    %390 = arith.addf %386, %389 : vector<1x8x8xf32>
    %391 = vector.extract_strided_slice %145 {offsets = [0, 2, 0], sizes = [1, 8, 8], strides = [1, 1, 1]} : vector<1x11x8xf32> to vector<1x8x8xf32>
    %cst_115 = arith.constant -5.000000e-02 : f32
    %392 = vector.broadcast %cst_115 : f32 to vector<1x8x8xf32>
    %393 = arith.mulf %392, %391 : vector<1x8x8xf32>
    %394 = arith.addf %390, %393 : vector<1x8x8xf32>
    %395 = vector.extract_strided_slice %191 {offsets = [0, 0, 0], sizes = [1, 8, 8], strides = [1, 1, 1]} : vector<1x11x8xf32> to vector<1x8x8xf32>
    %cst_116 = arith.constant -5.000000e-02 : f32
    %396 = vector.broadcast %cst_116 : f32 to vector<1x8x8xf32>
    %397 = arith.mulf %396, %395 : vector<1x8x8xf32>
    %398 = vector.extract_strided_slice %99 {offsets = [0, 1, 0], sizes = [1, 8, 8], strides = [1, 1, 1]} : vector<1x11x8xf32> to vector<1x8x8xf32>
    %cst_117 = arith.constant 2.500000e-01 : f32
    %399 = vector.broadcast %cst_117 : f32 to vector<1x8x8xf32>
    %400 = arith.mulf %399, %398 : vector<1x8x8xf32>
    %401 = arith.addf %397, %400 : vector<1x8x8xf32>
    %402 = vector.extract_strided_slice %191 {offsets = [0, 1, 0], sizes = [1, 8, 8], strides = [1, 1, 1]} : vector<1x11x8xf32> to vector<1x8x8xf32>
    %cst_118 = arith.constant 5.000000e-01 : f32
    %403 = vector.broadcast %cst_118 : f32 to vector<1x8x8xf32>
    %404 = arith.mulf %403, %402 : vector<1x8x8xf32>
    %405 = arith.addf %401, %404 : vector<1x8x8xf32>
    %406 = vector.extract_strided_slice %99 {offsets = [0, 2, 0], sizes = [1, 8, 8], strides = [1, 1, 1]} : vector<1x11x8xf32> to vector<1x8x8xf32>
    %cst_119 = arith.constant 2.500000e-01 : f32
    %407 = vector.broadcast %cst_119 : f32 to vector<1x8x8xf32>
    %408 = arith.mulf %407, %406 : vector<1x8x8xf32>
    %409 = arith.addf %405, %408 : vector<1x8x8xf32>
    %410 = vector.extract_strided_slice %191 {offsets = [0, 2, 0], sizes = [1, 8, 8], strides = [1, 1, 1]} : vector<1x11x8xf32> to vector<1x8x8xf32>
    %cst_120 = arith.constant -5.000000e-02 : f32
    %411 = vector.broadcast %cst_120 : f32 to vector<1x8x8xf32>
    %412 = arith.mulf %411, %410 : vector<1x8x8xf32>
    %413 = arith.addf %409, %412 : vector<1x8x8xf32>
    %414 = vector.extract_strided_slice %53 {offsets = [0, 1, 0], sizes = [1, 8, 8], strides = [1, 1, 1]} : vector<1x11x8xf32> to vector<1x8x8xf32>
    %cst_121 = arith.constant -5.000000e-02 : f32
    %415 = vector.broadcast %cst_121 : f32 to vector<1x8x8xf32>
    %416 = arith.mulf %415, %414 : vector<1x8x8xf32>
    %417 = vector.extract_strided_slice %145 {offsets = [0, 1, 0], sizes = [1, 8, 8], strides = [1, 1, 1]} : vector<1x11x8xf32> to vector<1x8x8xf32>
    %cst_122 = arith.constant 2.500000e-01 : f32
    %418 = vector.broadcast %cst_122 : f32 to vector<1x8x8xf32>
    %419 = arith.mulf %418, %417 : vector<1x8x8xf32>
    %420 = arith.addf %416, %419 : vector<1x8x8xf32>
    %421 = vector.extract_strided_slice %53 {offsets = [0, 2, 0], sizes = [1, 8, 8], strides = [1, 1, 1]} : vector<1x11x8xf32> to vector<1x8x8xf32>
    %cst_123 = arith.constant 5.000000e-01 : f32
    %422 = vector.broadcast %cst_123 : f32 to vector<1x8x8xf32>
    %423 = arith.mulf %422, %421 : vector<1x8x8xf32>
    %424 = arith.addf %420, %423 : vector<1x8x8xf32>
    %425 = vector.extract_strided_slice %145 {offsets = [0, 2, 0], sizes = [1, 8, 8], strides = [1, 1, 1]} : vector<1x11x8xf32> to vector<1x8x8xf32>
    %cst_124 = arith.constant 2.500000e-01 : f32
    %426 = vector.broadcast %cst_124 : f32 to vector<1x8x8xf32>
    %427 = arith.mulf %426, %425 : vector<1x8x8xf32>
    %428 = arith.addf %424, %427 : vector<1x8x8xf32>
    %429 = vector.extract_strided_slice %53 {offsets = [0, 3, 0], sizes = [1, 8, 8], strides = [1, 1, 1]} : vector<1x11x8xf32> to vector<1x8x8xf32>
    %cst_125 = arith.constant -5.000000e-02 : f32
    %430 = vector.broadcast %cst_125 : f32 to vector<1x8x8xf32>
    %431 = arith.mulf %430, %429 : vector<1x8x8xf32>
    %432 = arith.addf %428, %431 : vector<1x8x8xf32>
    %433 = vector.extract_strided_slice %99 {offsets = [0, 1, 0], sizes = [1, 8, 8], strides = [1, 1, 1]} : vector<1x11x8xf32> to vector<1x8x8xf32>
    %cst_126 = arith.constant -5.000000e-02 : f32
    %434 = vector.broadcast %cst_126 : f32 to vector<1x8x8xf32>
    %435 = arith.mulf %434, %433 : vector<1x8x8xf32>
    %436 = vector.extract_strided_slice %191 {offsets = [0, 1, 0], sizes = [1, 8, 8], strides = [1, 1, 1]} : vector<1x11x8xf32> to vector<1x8x8xf32>
    %cst_127 = arith.constant 2.500000e-01 : f32
    %437 = vector.broadcast %cst_127 : f32 to vector<1x8x8xf32>
    %438 = arith.mulf %437, %436 : vector<1x8x8xf32>
    %439 = arith.addf %435, %438 : vector<1x8x8xf32>
    %440 = vector.extract_strided_slice %99 {offsets = [0, 2, 0], sizes = [1, 8, 8], strides = [1, 1, 1]} : vector<1x11x8xf32> to vector<1x8x8xf32>
    %cst_128 = arith.constant 5.000000e-01 : f32
    %441 = vector.broadcast %cst_128 : f32 to vector<1x8x8xf32>
    %442 = arith.mulf %441, %440 : vector<1x8x8xf32>
    %443 = arith.addf %439, %442 : vector<1x8x8xf32>
    %444 = vector.extract_strided_slice %191 {offsets = [0, 2, 0], sizes = [1, 8, 8], strides = [1, 1, 1]} : vector<1x11x8xf32> to vector<1x8x8xf32>
    %cst_129 = arith.constant 2.500000e-01 : f32
    %445 = vector.broadcast %cst_129 : f32 to vector<1x8x8xf32>
    %446 = arith.mulf %445, %444 : vector<1x8x8xf32>
    %447 = arith.addf %443, %446 : vector<1x8x8xf32>
    %448 = vector.extract_strided_slice %99 {offsets = [0, 3, 0], sizes = [1, 8, 8], strides = [1, 1, 1]} : vector<1x11x8xf32> to vector<1x8x8xf32>
    %cst_130 = arith.constant -5.000000e-02 : f32
    %449 = vector.broadcast %cst_130 : f32 to vector<1x8x8xf32>
    %450 = arith.mulf %449, %448 : vector<1x8x8xf32>
    %451 = arith.addf %447, %450 : vector<1x8x8xf32>
    %452 = vector.extract_strided_slice %53 {offsets = [0, 0, 0], sizes = [1, 8, 8], strides = [1, 1, 1]} : vector<1x11x8xf32> to vector<1x8x8xf32>
    %cst_131 = arith.constant -0.010714286 : f32
    %453 = vector.broadcast %cst_131 : f32 to vector<1x8x8xf32>
    %454 = arith.mulf %453, %452 : vector<1x8x8xf32>
    %455 = vector.extract_strided_slice %145 {offsets = [0, 0, 0], sizes = [1, 8, 8], strides = [1, 1, 1]} : vector<1x11x8xf32> to vector<1x8x8xf32>
    %cst_132 = arith.constant 0.0535714291 : f32
    %456 = vector.broadcast %cst_132 : f32 to vector<1x8x8xf32>
    %457 = arith.mulf %456, %455 : vector<1x8x8xf32>
    %458 = arith.addf %454, %457 : vector<1x8x8xf32>
    %459 = vector.extract_strided_slice %53 {offsets = [0, 1, 0], sizes = [1, 8, 8], strides = [1, 1, 1]} : vector<1x11x8xf32> to vector<1x8x8xf32>
    %cst_133 = arith.constant 0.260714293 : f32
    %460 = vector.broadcast %cst_133 : f32 to vector<1x8x8xf32>
    %461 = arith.mulf %460, %459 : vector<1x8x8xf32>
    %462 = arith.addf %458, %461 : vector<1x8x8xf32>
    %463 = vector.extract_strided_slice %145 {offsets = [0, 1, 0], sizes = [1, 8, 8], strides = [1, 1, 1]} : vector<1x11x8xf32> to vector<1x8x8xf32>
    %cst_134 = arith.constant -0.607142865 : f32
    %464 = vector.broadcast %cst_134 : f32 to vector<1x8x8xf32>
    %465 = arith.mulf %464, %463 : vector<1x8x8xf32>
    %466 = arith.addf %462, %465 : vector<1x8x8xf32>
    %467 = vector.extract_strided_slice %53 {offsets = [0, 2, 0], sizes = [1, 8, 8], strides = [1, 1, 1]} : vector<1x11x8xf32> to vector<1x8x8xf32>
    %cst_135 = arith.constant 0.260714293 : f32
    %468 = vector.broadcast %cst_135 : f32 to vector<1x8x8xf32>
    %469 = arith.mulf %468, %467 : vector<1x8x8xf32>
    %470 = arith.addf %466, %469 : vector<1x8x8xf32>
    %471 = vector.extract_strided_slice %145 {offsets = [0, 2, 0], sizes = [1, 8, 8], strides = [1, 1, 1]} : vector<1x11x8xf32> to vector<1x8x8xf32>
    %cst_136 = arith.constant 0.0535714291 : f32
    %472 = vector.broadcast %cst_136 : f32 to vector<1x8x8xf32>
    %473 = arith.mulf %472, %471 : vector<1x8x8xf32>
    %474 = arith.addf %470, %473 : vector<1x8x8xf32>
    %475 = vector.extract_strided_slice %53 {offsets = [0, 3, 0], sizes = [1, 8, 8], strides = [1, 1, 1]} : vector<1x11x8xf32> to vector<1x8x8xf32>
    %cst_137 = arith.constant -0.010714286 : f32
    %476 = vector.broadcast %cst_137 : f32 to vector<1x8x8xf32>
    %477 = arith.mulf %476, %475 : vector<1x8x8xf32>
    %478 = arith.addf %474, %477 : vector<1x8x8xf32>
    %479 = vector.extract_strided_slice %99 {offsets = [0, 0, 0], sizes = [1, 8, 8], strides = [1, 1, 1]} : vector<1x11x8xf32> to vector<1x8x8xf32>
    %cst_138 = arith.constant -0.010714286 : f32
    %480 = vector.broadcast %cst_138 : f32 to vector<1x8x8xf32>
    %481 = arith.mulf %480, %479 : vector<1x8x8xf32>
    %482 = vector.extract_strided_slice %191 {offsets = [0, 0, 0], sizes = [1, 8, 8], strides = [1, 1, 1]} : vector<1x11x8xf32> to vector<1x8x8xf32>
    %cst_139 = arith.constant 0.0535714291 : f32
    %483 = vector.broadcast %cst_139 : f32 to vector<1x8x8xf32>
    %484 = arith.mulf %483, %482 : vector<1x8x8xf32>
    %485 = arith.addf %481, %484 : vector<1x8x8xf32>
    %486 = vector.extract_strided_slice %99 {offsets = [0, 1, 0], sizes = [1, 8, 8], strides = [1, 1, 1]} : vector<1x11x8xf32> to vector<1x8x8xf32>
    %cst_140 = arith.constant 0.260714293 : f32
    %487 = vector.broadcast %cst_140 : f32 to vector<1x8x8xf32>
    %488 = arith.mulf %487, %486 : vector<1x8x8xf32>
    %489 = arith.addf %485, %488 : vector<1x8x8xf32>
    %490 = vector.extract_strided_slice %191 {offsets = [0, 1, 0], sizes = [1, 8, 8], strides = [1, 1, 1]} : vector<1x11x8xf32> to vector<1x8x8xf32>
    %cst_141 = arith.constant -0.607142865 : f32
    %491 = vector.broadcast %cst_141 : f32 to vector<1x8x8xf32>
    %492 = arith.mulf %491, %490 : vector<1x8x8xf32>
    %493 = arith.addf %489, %492 : vector<1x8x8xf32>
    %494 = vector.extract_strided_slice %99 {offsets = [0, 2, 0], sizes = [1, 8, 8], strides = [1, 1, 1]} : vector<1x11x8xf32> to vector<1x8x8xf32>
    %cst_142 = arith.constant 0.260714293 : f32
    %495 = vector.broadcast %cst_142 : f32 to vector<1x8x8xf32>
    %496 = arith.mulf %495, %494 : vector<1x8x8xf32>
    %497 = arith.addf %493, %496 : vector<1x8x8xf32>
    %498 = vector.extract_strided_slice %191 {offsets = [0, 2, 0], sizes = [1, 8, 8], strides = [1, 1, 1]} : vector<1x11x8xf32> to vector<1x8x8xf32>
    %cst_143 = arith.constant 0.0535714291 : f32
    %499 = vector.broadcast %cst_143 : f32 to vector<1x8x8xf32>
    %500 = arith.mulf %499, %498 : vector<1x8x8xf32>
    %501 = arith.addf %497, %500 : vector<1x8x8xf32>
    %502 = vector.extract_strided_slice %99 {offsets = [0, 3, 0], sizes = [1, 8, 8], strides = [1, 1, 1]} : vector<1x11x8xf32> to vector<1x8x8xf32>
    %cst_144 = arith.constant -0.010714286 : f32
    %503 = vector.broadcast %cst_144 : f32 to vector<1x8x8xf32>
    %504 = arith.mulf %503, %502 : vector<1x8x8xf32>
    %505 = arith.addf %501, %504 : vector<1x8x8xf32>
    %506 = vector.extract_strided_slice %145 {offsets = [0, 0, 0], sizes = [1, 8, 8], strides = [1, 1, 1]} : vector<1x11x8xf32> to vector<1x8x8xf32>
    %cst_145 = arith.constant -0.010714286 : f32
    %507 = vector.broadcast %cst_145 : f32 to vector<1x8x8xf32>
    %508 = arith.mulf %507, %506 : vector<1x8x8xf32>
    %509 = vector.extract_strided_slice %53 {offsets = [0, 1, 0], sizes = [1, 8, 8], strides = [1, 1, 1]} : vector<1x11x8xf32> to vector<1x8x8xf32>
    %cst_146 = arith.constant 0.0535714291 : f32
    %510 = vector.broadcast %cst_146 : f32 to vector<1x8x8xf32>
    %511 = arith.mulf %510, %509 : vector<1x8x8xf32>
    %512 = arith.addf %508, %511 : vector<1x8x8xf32>
    %513 = vector.extract_strided_slice %145 {offsets = [0, 1, 0], sizes = [1, 8, 8], strides = [1, 1, 1]} : vector<1x11x8xf32> to vector<1x8x8xf32>
    %cst_147 = arith.constant 0.260714293 : f32
    %514 = vector.broadcast %cst_147 : f32 to vector<1x8x8xf32>
    %515 = arith.mulf %514, %513 : vector<1x8x8xf32>
    %516 = arith.addf %512, %515 : vector<1x8x8xf32>
    %517 = vector.extract_strided_slice %53 {offsets = [0, 2, 0], sizes = [1, 8, 8], strides = [1, 1, 1]} : vector<1x11x8xf32> to vector<1x8x8xf32>
    %cst_148 = arith.constant -0.607142865 : f32
    %518 = vector.broadcast %cst_148 : f32 to vector<1x8x8xf32>
    %519 = arith.mulf %518, %517 : vector<1x8x8xf32>
    %520 = arith.addf %516, %519 : vector<1x8x8xf32>
    %521 = vector.extract_strided_slice %145 {offsets = [0, 2, 0], sizes = [1, 8, 8], strides = [1, 1, 1]} : vector<1x11x8xf32> to vector<1x8x8xf32>
    %cst_149 = arith.constant 0.260714293 : f32
    %522 = vector.broadcast %cst_149 : f32 to vector<1x8x8xf32>
    %523 = arith.mulf %522, %521 : vector<1x8x8xf32>
    %524 = arith.addf %520, %523 : vector<1x8x8xf32>
    %525 = vector.extract_strided_slice %53 {offsets = [0, 3, 0], sizes = [1, 8, 8], strides = [1, 1, 1]} : vector<1x11x8xf32> to vector<1x8x8xf32>
    %cst_150 = arith.constant 0.0535714291 : f32
    %526 = vector.broadcast %cst_150 : f32 to vector<1x8x8xf32>
    %527 = arith.mulf %526, %525 : vector<1x8x8xf32>
    %528 = arith.addf %524, %527 : vector<1x8x8xf32>
    %529 = vector.extract_strided_slice %145 {offsets = [0, 3, 0], sizes = [1, 8, 8], strides = [1, 1, 1]} : vector<1x11x8xf32> to vector<1x8x8xf32>
    %cst_151 = arith.constant -0.010714286 : f32
    %530 = vector.broadcast %cst_151 : f32 to vector<1x8x8xf32>
    %531 = arith.mulf %530, %529 : vector<1x8x8xf32>
    %532 = arith.addf %528, %531 : vector<1x8x8xf32>
    %533 = vector.extract_strided_slice %191 {offsets = [0, 0, 0], sizes = [1, 8, 8], strides = [1, 1, 1]} : vector<1x11x8xf32> to vector<1x8x8xf32>
    %cst_152 = arith.constant -0.010714286 : f32
    %534 = vector.broadcast %cst_152 : f32 to vector<1x8x8xf32>
    %535 = arith.mulf %534, %533 : vector<1x8x8xf32>
    %536 = vector.extract_strided_slice %99 {offsets = [0, 1, 0], sizes = [1, 8, 8], strides = [1, 1, 1]} : vector<1x11x8xf32> to vector<1x8x8xf32>
    %cst_153 = arith.constant 0.0535714291 : f32
    %537 = vector.broadcast %cst_153 : f32 to vector<1x8x8xf32>
    %538 = arith.mulf %537, %536 : vector<1x8x8xf32>
    %539 = arith.addf %535, %538 : vector<1x8x8xf32>
    %540 = vector.extract_strided_slice %191 {offsets = [0, 1, 0], sizes = [1, 8, 8], strides = [1, 1, 1]} : vector<1x11x8xf32> to vector<1x8x8xf32>
    %cst_154 = arith.constant 0.260714293 : f32
    %541 = vector.broadcast %cst_154 : f32 to vector<1x8x8xf32>
    %542 = arith.mulf %541, %540 : vector<1x8x8xf32>
    %543 = arith.addf %539, %542 : vector<1x8x8xf32>
    %544 = vector.extract_strided_slice %99 {offsets = [0, 2, 0], sizes = [1, 8, 8], strides = [1, 1, 1]} : vector<1x11x8xf32> to vector<1x8x8xf32>
    %cst_155 = arith.constant -0.607142865 : f32
    %545 = vector.broadcast %cst_155 : f32 to vector<1x8x8xf32>
    %546 = arith.mulf %545, %544 : vector<1x8x8xf32>
    %547 = arith.addf %543, %546 : vector<1x8x8xf32>
    %548 = vector.extract_strided_slice %191 {offsets = [0, 2, 0], sizes = [1, 8, 8], strides = [1, 1, 1]} : vector<1x11x8xf32> to vector<1x8x8xf32>
    %cst_156 = arith.constant 0.260714293 : f32
    %549 = vector.broadcast %cst_156 : f32 to vector<1x8x8xf32>
    %550 = arith.mulf %549, %548 : vector<1x8x8xf32>
    %551 = arith.addf %547, %550 : vector<1x8x8xf32>
    %552 = vector.extract_strided_slice %99 {offsets = [0, 3, 0], sizes = [1, 8, 8], strides = [1, 1, 1]} : vector<1x11x8xf32> to vector<1x8x8xf32>
    %cst_157 = arith.constant 0.0535714291 : f32
    %553 = vector.broadcast %cst_157 : f32 to vector<1x8x8xf32>
    %554 = arith.mulf %553, %552 : vector<1x8x8xf32>
    %555 = arith.addf %551, %554 : vector<1x8x8xf32>
    %556 = vector.extract_strided_slice %191 {offsets = [0, 3, 0], sizes = [1, 8, 8], strides = [1, 1, 1]} : vector<1x11x8xf32> to vector<1x8x8xf32>
    %cst_158 = arith.constant -0.010714286 : f32
    %557 = vector.broadcast %cst_158 : f32 to vector<1x8x8xf32>
    %558 = arith.mulf %557, %556 : vector<1x8x8xf32>
    %559 = arith.addf %555, %558 : vector<1x8x8xf32>
    %560 = arith.addf %210, %229 : vector<1x8x8xf32>
    %561 = arith.addf %560, %248 : vector<1x8x8xf32>
    %562 = arith.addf %561, %267 : vector<1x8x8xf32>
    %cst_159 = arith.constant 2.500000e-01 : f32
    %563 = vector.broadcast %cst_159 : f32 to vector<1x8x8xf32>
    %564 = arith.mulf %563, %562 : vector<1x8x8xf32>
    %c0_160 = arith.constant 0 : index
    %c0_161 = arith.constant 0 : index
    %c0_162 = arith.constant 0 : index
    %c0_163 = arith.constant 0 : index
    %c0_164 = arith.constant 0 : index
    %565 = vector.load %arg3[%c0_160, %c0_161, %c0_162, %c0_163, %c0_164] : memref<1x7x1x8x8xf32, #tpu.memory_space<vmem>>, vector<1x1x1x8x8xf32>
    %566 = vector.shape_cast %565 : vector<1x1x1x8x8xf32> to vector<1x8x8xf32>
    %567 = vector.shape_cast %564 : vector<1x8x8xf32> to vector<1x1x1x8x8xf32>
    tpu.vector_store %arg3[%c0_160, %c0_161, %c0_162, %c0_163, %c0_164], %567 {strides = array<i32>} : memref<1x7x1x8x8xf32, #tpu.memory_space<vmem>>, vector<1x1x1x8x8xf32>,
    %568 = arith.subf %294, %375 : vector<1x8x8xf32>
    %cst_165 = arith.constant 0.707106769 : f32
    %569 = vector.broadcast %cst_165 : f32 to vector<1x8x8xf32>
    %570 = arith.mulf %568, %569 : vector<1x8x8xf32>
    %571 = arith.addf %321, %348 : vector<1x8x8xf32>
    %cst_166 = arith.constant 0.707106769 : f32
    %572 = vector.broadcast %cst_166 : f32 to vector<1x8x8xf32>
    %573 = arith.mulf %571, %572 : vector<1x8x8xf32>
    %574 = arith.addf %294, %375 : vector<1x8x8xf32>
    %cst_167 = arith.constant 0.707106769 : f32
    %575 = vector.broadcast %cst_167 : f32 to vector<1x8x8xf32>
    %576 = arith.mulf %574, %575 : vector<1x8x8xf32>
    %577 = arith.subf %321, %348 : vector<1x8x8xf32>
    %cst_168 = arith.constant 0.707106769 : f32
    %578 = vector.broadcast %cst_168 : f32 to vector<1x8x8xf32>
    %579 = arith.mulf %577, %578 : vector<1x8x8xf32>
    %580 = arith.mulf %570, %570 : vector<1x8x8xf32>
    %581 = arith.mulf %573, %573 : vector<1x8x8xf32>
    %582 = arith.addf %580, %581 : vector<1x8x8xf32>
    %cst_169 = arith.constant 9.99999974E-5 : f32
    %583 = vector.broadcast %cst_169 : f32 to vector<1x8x8xf32>
    %584 = arith.addf %582, %583 : vector<1x8x8xf32>
    %585 = math.sqrt %584 : vector<1x8x8xf32>
    %cst_170 = arith.constant 0.00999999977 : f32
    %586 = vector.broadcast %cst_170 : f32 to vector<1x8x8xf32>
    %587 = arith.subf %585, %586 : vector<1x8x8xf32>
    %c0_171 = arith.constant 0 : index
    %c1_172 = arith.constant 1 : index
    %c0_173 = arith.constant 0 : index
    %c0_174 = arith.constant 0 : index
    %c0_175 = arith.constant 0 : index
    %588 = vector.load %arg3[%c0_171, %c1_172, %c0_173, %c0_174, %c0_175] : memref<1x7x1x8x8xf32, #tpu.memory_space<vmem>>, vector<1x1x1x8x8xf32>
    %589 = vector.shape_cast %588 : vector<1x1x1x8x8xf32> to vector<1x8x8xf32>
    %590 = vector.shape_cast %587 : vector<1x8x8xf32> to vector<1x1x1x8x8xf32>
    tpu.vector_store %arg3[%c0_171, %c1_172, %c0_173, %c0_174, %c0_175], %590 {strides = array<i32>} : memref<1x7x1x8x8xf32, #tpu.memory_space<vmem>>, vector<1x1x1x8x8xf32>,
    %591 = arith.mulf %576, %576 : vector<1x8x8xf32>
    %592 = arith.mulf %579, %579 : vector<1x8x8xf32>
    %593 = arith.addf %591, %592 : vector<1x8x8xf32>
    %cst_176 = arith.constant 9.99999974E-5 : f32
    %594 = vector.broadcast %cst_176 : f32 to vector<1x8x8xf32>
    %595 = arith.addf %593, %594 : vector<1x8x8xf32>
    %596 = math.sqrt %595 : vector<1x8x8xf32>
    %cst_177 = arith.constant 0.00999999977 : f32
    %597 = vector.broadcast %cst_177 : f32 to vector<1x8x8xf32>
    %598 = arith.subf %596, %597 : vector<1x8x8xf32>
    %c0_178 = arith.constant 0 : index
    %c6 = arith.constant 6 : index
    %c0_179 = arith.constant 0 : index
    %c0_180 = arith.constant 0 : index
    %c0_181 = arith.constant 0 : index
    %599 = vector.load %arg3[%c0_178, %c6, %c0_179, %c0_180, %c0_181] : memref<1x7x1x8x8xf32, #tpu.memory_space<vmem>>, vector<1x1x1x8x8xf32>
    %600 = vector.shape_cast %599 : vector<1x1x1x8x8xf32> to vector<1x8x8xf32>
    %601 = vector.shape_cast %598 : vector<1x8x8xf32> to vector<1x1x1x8x8xf32>
    tpu.vector_store %arg3[%c0_178, %c6, %c0_179, %c0_180, %c0_181], %601 {strides = array<i32>} : memref<1x7x1x8x8xf32, #tpu.memory_space<vmem>>, vector<1x1x1x8x8xf32>,
    %602 = arith.subf %394, %451 : vector<1x8x8xf32>
    %cst_182 = arith.constant 0.707106769 : f32
    %603 = vector.broadcast %cst_182 : f32 to vector<1x8x8xf32>
    %604 = arith.mulf %602, %603 : vector<1x8x8xf32>
    %605 = arith.addf %413, %432 : vector<1x8x8xf32>
    %cst_183 = arith.constant 0.707106769 : f32
    %606 = vector.broadcast %cst_183 : f32 to vector<1x8x8xf32>
    %607 = arith.mulf %605, %606 : vector<1x8x8xf32>
    %608 = arith.addf %394, %451 : vector<1x8x8xf32>
    %cst_184 = arith.constant 0.707106769 : f32
    %609 = vector.broadcast %cst_184 : f32 to vector<1x8x8xf32>
    %610 = arith.mulf %608, %609 : vector<1x8x8xf32>
    %611 = arith.subf %413, %432 : vector<1x8x8xf32>
    %cst_185 = arith.constant 0.707106769 : f32
    %612 = vector.broadcast %cst_185 : f32 to vector<1x8x8xf32>
    %613 = arith.mulf %611, %612 : vector<1x8x8xf32>
    %614 = arith.mulf %604, %604 : vector<1x8x8xf32>
    %615 = arith.mulf %607, %607 : vector<1x8x8xf32>
    %616 = arith.addf %614, %615 : vector<1x8x8xf32>
    %cst_186 = arith.constant 9.99999974E-5 : f32
    %617 = vector.broadcast %cst_186 : f32 to vector<1x8x8xf32>
    %618 = arith.addf %616, %617 : vector<1x8x8xf32>
    %619 = math.sqrt %618 : vector<1x8x8xf32>
    %cst_187 = arith.constant 0.00999999977 : f32
    %620 = vector.broadcast %cst_187 : f32 to vector<1x8x8xf32>
    %621 = arith.subf %619, %620 : vector<1x8x8xf32>
    %c0_188 = arith.constant 0 : index
    %c3_189 = arith.constant 3 : index
    %c0_190 = arith.constant 0 : index
    %c0_191 = arith.constant 0 : index
    %c0_192 = arith.constant 0 : index
    %622 = vector.load %arg3[%c0_188, %c3_189, %c0_190, %c0_191, %c0_192] : memref<1x7x1x8x8xf32, #tpu.memory_space<vmem>>, vector<1x1x1x8x8xf32>
    %623 = vector.shape_cast %622 : vector<1x1x1x8x8xf32> to vector<1x8x8xf32>
    %624 = vector.shape_cast %621 : vector<1x8x8xf32> to vector<1x1x1x8x8xf32>
    tpu.vector_store %arg3[%c0_188, %c3_189, %c0_190, %c0_191, %c0_192], %624 {strides = array<i32>} : memref<1x7x1x8x8xf32, #tpu.memory_space<vmem>>, vector<1x1x1x8x8xf32>,
    %625 = arith.mulf %610, %610 : vector<1x8x8xf32>
    %626 = arith.mulf %613, %613 : vector<1x8x8xf32>
    %627 = arith.addf %625, %626 : vector<1x8x8xf32>
    %cst_193 = arith.constant 9.99999974E-5 : f32
    %628 = vector.broadcast %cst_193 : f32 to vector<1x8x8xf32>
    %629 = arith.addf %627, %628 : vector<1x8x8xf32>
    %630 = math.sqrt %629 : vector<1x8x8xf32>
    %cst_194 = arith.constant 0.00999999977 : f32
    %631 = vector.broadcast %cst_194 : f32 to vector<1x8x8xf32>
    %632 = arith.subf %630, %631 : vector<1x8x8xf32>
    %c0_195 = arith.constant 0 : index
    %c4 = arith.constant 4 : index
    %c0_196 = arith.constant 0 : index
    %c0_197 = arith.constant 0 : index
    %c0_198 = arith.constant 0 : index
    %633 = vector.load %arg3[%c0_195, %c4, %c0_196, %c0_197, %c0_198] : memref<1x7x1x8x8xf32, #tpu.memory_space<vmem>>, vector<1x1x1x8x8xf32>
    %634 = vector.shape_cast %633 : vector<1x1x1x8x8xf32> to vector<1x8x8xf32>
    %635 = vector.shape_cast %632 : vector<1x8x8xf32> to vector<1x1x1x8x8xf32>
    tpu.vector_store %arg3[%c0_195, %c4, %c0_196, %c0_197, %c0_198], %635 {strides = array<i32>} : memref<1x7x1x8x8xf32, #tpu.memory_space<vmem>>, vector<1x1x1x8x8xf32>,
    %636 = arith.subf %478, %559 : vector<1x8x8xf32>
    %cst_199 = arith.constant 0.707106769 : f32
    %637 = vector.broadcast %cst_199 : f32 to vector<1x8x8xf32>
    %638 = arith.mulf %636, %637 : vector<1x8x8xf32>
    %639 = arith.addf %505, %532 : vector<1x8x8xf32>
    %cst_200 = arith.constant 0.707106769 : f32
    %640 = vector.broadcast %cst_200 : f32 to vector<1x8x8xf32>
    %641 = arith.mulf %639, %640 : vector<1x8x8xf32>
    %642 = arith.addf %478, %559 : vector<1x8x8xf32>
    %cst_201 = arith.constant 0.707106769 : f32
    %643 = vector.broadcast %cst_201 : f32 to vector<1x8x8xf32>
    %644 = arith.mulf %642, %643 : vector<1x8x8xf32>
    %645 = arith.subf %505, %532 : vector<1x8x8xf32>
    %cst_202 = arith.constant 0.707106769 : f32
    %646 = vector.broadcast %cst_202 : f32 to vector<1x8x8xf32>
    %647 = arith.mulf %645, %646 : vector<1x8x8xf32>
    %648 = arith.mulf %638, %638 : vector<1x8x8xf32>
    %649 = arith.mulf %641, %641 : vector<1x8x8xf32>
    %650 = arith.addf %648, %649 : vector<1x8x8xf32>
    %cst_203 = arith.constant 9.99999974E-5 : f32
    %651 = vector.broadcast %cst_203 : f32 to vector<1x8x8xf32>
    %652 = arith.addf %650, %651 : vector<1x8x8xf32>
    %653 = math.sqrt %652 : vector<1x8x8xf32>
    %cst_204 = arith.constant 0.00999999977 : f32
    %654 = vector.broadcast %cst_204 : f32 to vector<1x8x8xf32>
    %655 = arith.subf %653, %654 : vector<1x8x8xf32>
    %c0_205 = arith.constant 0 : index
    %c2_206 = arith.constant 2 : index
    %c0_207 = arith.constant 0 : index
    %c0_208 = arith.constant 0 : index
    %c0_209 = arith.constant 0 : index
    %656 = vector.load %arg3[%c0_205, %c2_206, %c0_207, %c0_208, %c0_209] : memref<1x7x1x8x8xf32, #tpu.memory_space<vmem>>, vector<1x1x1x8x8xf32>
    %657 = vector.shape_cast %656 : vector<1x1x1x8x8xf32> to vector<1x8x8xf32>
    %658 = vector.shape_cast %655 : vector<1x8x8xf32> to vector<1x1x1x8x8xf32>
    tpu.vector_store %arg3[%c0_205, %c2_206, %c0_207, %c0_208, %c0_209], %658 {strides = array<i32>} : memref<1x7x1x8x8xf32, #tpu.memory_space<vmem>>, vector<1x1x1x8x8xf32>,
    %659 = arith.mulf %644, %644 : vector<1x8x8xf32>
    %660 = arith.mulf %647, %647 : vector<1x8x8xf32>
    %661 = arith.addf %659, %660 : vector<1x8x8xf32>
    %cst_210 = arith.constant 9.99999974E-5 : f32
    %662 = vector.broadcast %cst_210 : f32 to vector<1x8x8xf32>
    %663 = arith.addf %661, %662 : vector<1x8x8xf32>
    %664 = math.sqrt %663 : vector<1x8x8xf32>
    %cst_211 = arith.constant 0.00999999977 : f32
    %665 = vector.broadcast %cst_211 : f32 to vector<1x8x8xf32>
    %666 = arith.subf %664, %665 : vector<1x8x8xf32>
    %c0_212 = arith.constant 0 : index
    %c5 = arith.constant 5 : index
    %c0_213 = arith.constant 0 : index
    %c0_214 = arith.constant 0 : index
    %c0_215 = arith.constant 0 : index
    %667 = vector.load %arg3[%c0_212, %c5, %c0_213, %c0_214, %c0_215] : memref<1x7x1x8x8xf32, #tpu.memory_space<vmem>>, vector<1x1x1x8x8xf32>
    %668 = vector.shape_cast %667 : vector<1x1x1x8x8xf32> to vector<1x8x8xf32>
    %669 = vector.shape_cast %666 : vector<1x8x8xf32> to vector<1x1x1x8x8xf32>
    tpu.vector_store %arg3[%c0_212, %c5, %c0_213, %c0_214, %c0_215], %669 {strides = array<i32>} : memref<1x7x1x8x8xf32, #tpu.memory_space<vmem>>, vector<1x1x1x8x8xf32>,
    return
  }
  func.func @transform_0(%arg0: i32, %arg1: i32) -> (i32, i32, i32, i32, i32) {
    %c0_i32 = arith.constant 0 : i32
    %c0_i32_0 = arith.constant 0 : i32
    %c0_i32_1 = arith.constant 0 : i32
    %c0_i32_2 = arith.constant 0 : i32
    return %arg0, %c0_i32, %arg1, %c0_i32_0, %c0_i32_1 : i32, i32, i32, i32, i32
  }
  func.func @transform_1(%arg0: i32, %arg1: i32) -> (i32, i32, i32, i32, i32) {
    %c0_i32 = arith.constant 0 : i32
    %c0_i32_0 = arith.constant 0 : i32
    %c0_i32_1 = arith.constant 0 : i32
    %c0_i32_2 = arith.constant 0 : i32
    return %arg0, %c0_i32, %arg1, %c0_i32_0, %c0_i32_1 : i32, i32, i32, i32, i32
  }
}

</mosaic_0001>

<bundles_post_ra>
// kernel: scat_layer_j1.1
= control target key start
LH: loop header
LB: loop body
LE: loop exit
PB: predicated region body
PF: predicated region fallthrough
CT: control target
= control target key end

     0   :  { %s1709_s6 = smov 0   ;;  %s1711_s7 = smov 0   ;;  %s2608_s0 = inlined_call_operand.vmem [shape: f32[2,4,4,11,11], index: 0, kind: input, shape index: {}]   ;;  %s2609_s1 = inlined_call_operand.vmem [shape: f32[2,7,4,8,8], index: 1, kind: output, shape index: {}]  }
   0x1   :  { %s1713_s8 = smov 0   ;;  %s1715_s9 = smov 0  }
   0x2   :  { %s1717_s10 = smov 0   ;;  %s1719_s11 = smov 0  }
   0x3   :  { %s1721_s12 = smov 0  }
   0x4 LB: > { %s20_s13 = sadd.s32 1, %s1685_s10  ;;  %s23_s14 = sadd.s32 1, %s1689_s11  ;;  %s1693_s12 = sphi %s1721_s12, %s11_s12   ;;  %s1689_s11 = sphi %s1719_s11, %s2650_s11   ;;  %s1685_s10 = sphi %s1717_s10, %s2649_s10   ;;  %s1681_s9 = sphi %s1715_s9, %s2648_s9   ;;  %s1677_s8 = sphi %s1713_s8, %s2647_s8   ;;  %s1673_s7 = sphi %s1711_s7, %s2646_s7   ;;  %s1669_s6 = sphi %s1709_s6, %s2645_s6  }
   0x5   : > { %p21_p0 = scmp.ge.s32.totalorder %s20_s13, 4  ;;  %s1534_s15 = sadd.s32 4294967295, %s1693_s12  }
   0x6   : > { %p39_p1 = scmp.ne.s32.totalorder %s1673_s7, %s1669_s6  ;;  %p40_p2 = scmp.eq.s32.totalorder %s1693_s12, 0 }
   0x7   : > { %s2652_s13 = smov (%p21_p0, %s20_s13), 0  ;;  %s2654_s14 = smov (!%p21_p0, %s23_s14), %s1689_s11 }
   0x8   : > { %p25_p3 = scmp.ge.s32.totalorder %s2654_s14, 2  ;;  %p71_p4 = scmp.eq.s32.totalorder %s1534_s15, 7 }
   0x9   : > { %s28_s16 = ssub.s32 %s1685_s10, %s2652_s13  ;;  %p41_p5 = por %p40_p2, %p39_p1 }
   0xa   : > { %s2656_s14 = smov (%p25_p3, %s2654_s14), 0  ;;  %p1757_p6 = por %p71_p4, %p39_p1 }
   0xb   : > { %s27_s18 = ssub.s32 %s1689_s11, %s2656_s14  ;;  %s32_s20 = sadd.s32 1, %s1673_s7 }
   0xc   : > { %s29_s19 = sor.u32 %s28_s16, %s27_s18  ;;  %p1537_p8 = scmp.ge.s32.totalorder %s1693_s12, 8 }
   0xd   : > { %p30_p7 = scmp.eq.s32.totalorder %s29_s19, 0 }
   0xe   : > { %93 = sbr.rel (%p1537_p8) target bundleno = 32 (0x20), region = 16 }
   0xf   : > { %s1765_s21 = scalar_select %p30_p7, %s1673_s7, %s32_s20  }
  0x15   : > { %96 = sbr.rel (!%p41_p5) target bundleno = 32 (0x20), region = 20  ;;  %s98_s22 = sand.u32 (%p41_p5), 1, %s1673_s7  }
  0x16   : > { %s1539_s23 = sshll.u32 (%p41_p5), %s1685_s10, 1  ;;  %s1538_s24 = sshll.u32 (%p41_p5), %s98_s22, 6 }
  0x17   : > { %s1540_s25 = sshll.u32 (%p41_p5), %s1689_s11, 5  ;;  %s100_s2 = scalar_lea.vmem (%p41_p5), [#allocation2], %s1538_s24 }
  0x18   : > { %s103_s26 = sadd.s32 (%p41_p5), %s1540_s25, %s1539_s23 }
  0x19   : > { %s1541_s27 = sshll.u32 (%p41_p5), %s103_s26, 3 }
  0x1a   : > { %s105_s30 = scalar_lea.vmem (%p41_p5), %s2608_s0, %s1541_s27 }
  0x1b   : > { %v147_v0 = vld [vmem:[%s105_s30] sm:$0xff] (%p41_p5)  ;;  %v149_v1 = vld [vmem:[%s105_s30 + $0x8] sm:$0xff] (%p41_p5) }
  0x1c   : > { %v151_v2 = vld [vmem:[%s105_s30 + $0x40] sm:$0xff]  ;;  %148 = vst [vmem:[%s100_s2] sm:$0xff] %v147_v0  ;;  %150 = vst [vmem:[%s100_s2 + $0x8] sm:$0xff] %v149_v1  ;;  %v153_v3 = vld [vmem:[%s105_s30 + $0x48] sm:$0xff] }
  0x1d   : > { %152 = vst [vmem:[%s100_s2 + $0x10] sm:$0xff] %v151_v2  ;;  %v155_v4 = vld [vmem:[%s105_s30 + $0x80] sm:$0xff]  ;;  %v157_v5 = vld [vmem:[%s105_s30 + $0x88] sm:$0xff]  ;;  %154 = vst [vmem:[%s100_s2 + $0x18] sm:$0xff] %v153_v3 }
  0x1e   : > { %156 = vst [vmem:[%s100_s2 + $0x20] sm:$0xff] %v155_v4  ;;  %158 = vst [vmem:[%s100_s2 + $0x28] sm:$0xff] %v157_v5  ;;  %v159_v6 = vld [vmem:[%s105_s30 + $0xc0] sm:$0xff]  ;;  %v161_v7 = vld [vmem:[%s105_s30 + $0xc8] sm:$0xff] }
  0x1f   : > { %160 = vst [vmem:[%s100_s2 + $0x30] sm:$0xff] %v159_v6  ;;  %162 = vst [vmem:[%s100_s2 + $0x38] sm:$0xff] %v161_v7 }
  0x20 PF: > { %p1542_p9 = scmp.ge.s32.totalorder %s1693_s12, 1  ;;  %p167_p10 = scmp.lt.s32.totalorder %s1693_s12, 9 }
  0x22   : > { %p168_p11 = pnand %p1542_p9, %p167_p10 }
  0x23   : > { %s174_s3 = sand.u32 (!%p168_p11), 1, %s1669_s6   ;;  %s1695_s15 = smov (!%p168_p11), 127   ;;  %vm616_vm0 = vcmask (!%p168_p11), 1046528   ;;  %vm631_vm1 = vcmask (!%p168_p11), 1045504   ;;  %vm784_vm2 = vcmask (!%p168_p11), 1044480   ;;  %vm1256_vm6 = vcmask (!%p168_p11), 64512  }
  0x24   : > { %171 = sbr.rel (%p168_p11) target bundleno = 468 (0x1d4), region = 58  ;;  %s1543_s4 = sshll.u32 (!%p168_p11), %s174_s3, 6 }
  0x25   : > { %s176_s5 = scalar_lea.vmem (!%p168_p11), [#allocation2], %s1543_s4  ;;  %s1696_s16 = smov (!%p168_p11), 126  }
  0x26   : > { %v1779_v8 = vld [vmem:[%s176_s5 + $0x10] sm:$0xff] (!%p168_p11)  ;;  %v1781_v9 = vld [vmem:[%s176_s5] sm:$0xff] (!%p168_p11)  ;;  %v1783_v10 = vld [vmem:[%s176_s5 + $0x18] sm:$0x7] (!%p168_p11)  ;;  %s1697_s18 = smov (!%p168_p11), 125   ;;  %s1698_s19 = smov (!%p168_p11), 1  }
  0x27   : > { %v217_v11 = vmul.f32 (!%p168_p11), 0.5, %v1779_v8  ;;  %v205_v12 = vmul.f32 (!%p168_p11), 0.25, %v1781_v9  ;;  %v1787_v13 = vld [vmem:[%s176_s5 + $0x8] sm:$0x7] (!%p168_p11)  ;;  %v218_v14 = vmul.f32 (!%p168_p11), 0.5, %v1783_v10  ;;  %v1795_v17 = vld [vmem:[%s176_s5 + $0x20] sm:$0xff] (!%p168_p11) }
  0x28   : > { %v206_v15 = vmul.f32 (!%p168_p11), 0.25, %v1787_v13  ;;  %v1793_v16 = vld [vmem:[%s176_s5 + $0x28] sm:$0x7] (!%p168_p11)  ;;  %v409_v19 = vmul.f32 (!%p168_p11), 0.25, %v1795_v17  ;;  %v1803_v20 = vld [vmem:[%s176_s5 + $0x38] sm:$0x7] (!%p168_p11) }
  0x29   : > { %221 = vrot.lane.b32.xlu1 (!%p168_p11), %v217_v11, %s1695_s15  ;;  %209 = vrot.lane.b32.xlu0 (!%p168_p11), %v205_v12, %s1695_s15  ;;  %v410_v18 = vmul.f32 (!%p168_p11), 0.25, %v1793_v16  ;;  %v1805_v21 = vld [vmem:[%s176_s5 + $0x30] sm:$0xff] (!%p168_p11)  ;;  %v422_v22 = vmul.f32 (!%p168_p11), 0.5, %v1803_v20  ;;  %v308_v24 = vmul.f32 (!%p168_p11), 0.25, %v1783_v10  ;;  %v306_v25 = vmul.f32 (!%p168_p11), -0.05, %v1787_v13 }
  0x2a   : > { %v421_v23 = vmul.f32 (!%p168_p11), 0.5, %v1805_v21  ;;  %v1818_v27 = vmul.f32 (!%p168_p11), -0.05, %v1783_v10  ;;  %v1821_v28 = vmul.f32 (!%p168_p11), -0.05, %v1779_v8  ;;  %v307_v29 = vmul.f32 (!%p168_p11), 0.25, %v1779_v8 }
  0x2b   : > { %v1813_v26 = vadd.f32 %v308_v24, %v306_v25  ;;  %v305_v30 = vmul.f32 -0.05, %v1781_v9  ;;  %v512_v32 = vmul.f32 0.25, %v1803_v20  ;;  %v510_v33 = vmul.f32 -0.05, %v1793_v16  ;;  %s1565_s20 = smul.u32 56, %s174_s3 }
  0x2c   : > { %v1838_v35 = vmul.f32 -0.05, %v1803_v20  ;;  %v1841_v36 = vmul.f32 -0.05, %v1805_v21  ;;  %v511_v37 = vmul.f32 0.25, %v1805_v21  ;;  %v312_v40 = vmul.f32 0.5, %v1787_v13 }
  0x2d   : > { %223 = vrot.lane.b32.xlu1 %v218_v14, %s1695_s15  ;;  %211 = vrot.lane.b32.xlu0 %v206_v15, %s1695_s15  ;;  %v1825_v31 = vadd.f32 %v307_v29, %v305_v30  ;;  %v1833_v34 = vadd.f32 %v512_v32, %v510_v33  ;;  %v509_v38 = vmul.f32 -0.05, %v1795_v17  ;;  %v311_v41 = vmul.f32 0.5, %v1781_v9  ;;  %s2553_s6 = scalar_lea.vmem [#allocation3], %s1565_s20  ;;  %s1566_s22 = smul.u32 (%p1757_p6), 28, %s1681_s9 }
  0x2e   : > { %v516_v42 = vmul.f32 0.5, %v1793_v16  ;;  %v515_v43 = vmul.f32 0.5, %v1795_v17  ;;  %v1868_v44 = vmul.f32 0.05357143, %v1787_v13  ;;  %v345_v45 = vmul.f32 0.05357143, %v1781_v9 }
  0x2f   : > { %v1845_v39 = vadd.f32 %v511_v37, %v509_v38  ;;  %v254_v46 = vmul.f32 0.2607143, %v1787_v13  ;;  %v253_v47 = vmul.f32 0.2607143, %v1781_v9  ;;  %v358_v48 = vmul.f32 0.2607143, %v1783_v10  ;;  %s1402_s23 = sadd.s32 (%p1757_p6), %s1677_s8, %s1566_s22 }
  0x30   : > { %v357_v49 = vmul.f32 0.2607143, %v1779_v8  ;;  %v1882_v50 = vmul.f32 0.05357143, %v1793_v16  ;;  %v549_v51 = vmul.f32 0.05357143, %v1795_v17 }
  0x31   : > { %415 = vrot.lane.b32.xlu1 %v410_v18, %s1695_s15  ;;  %413 = vrot.lane.b32.xlu0 %v409_v19, %s1695_s15  ;;  %v266_v52 = vmul.f32 -0.60714287, %v1783_v10  ;;  %v265_v53 = vmul.f32 -0.60714287, %v1779_v8  ;;  %v370_v54 = vmul.f32 -0.60714287, %v1787_v13 }
  0x32   : > { %v369_v55 = vmul.f32 -0.60714287, %v1781_v9  ;;  %v249_v56 = vmul.f32 0.05357143, %v1779_v8  ;;  %v247_v57 = vmul.f32 -0.010714286, %v1781_v9 }
  0x33   : > { %v453_v58 = vmul.f32 0.05357143, %v1805_v21  ;;  %v451_v59 = vmul.f32 -0.010714286, %v1795_v17  ;;  %v1901_v60 = vmul.f32 0.2607143, %v1793_v16 }
  0x34   : > { %v457_v61 = vmul.f32 0.2607143, %v1795_v17  ;;  %v1905_v62 = vadd.f32 %v249_v56, %v247_v57  ;;  %v1912_v0 = vmul.f32 0.2607143, %v1803_v20  ;;  %v561_v1 = vmul.f32 0.2607143, %v1805_v21 }
  0x35   : > { %231 = vrot.lane.b32.xlu1 %v206_v15, %s1696_s16  ;;  %229 = vrot.lane.b32.xlu0 %v205_v12, %s1696_s16  ;;  %v1907_v63 = vadd.f32 %v453_v58, %v451_v59  ;;  %v469_v2 = vmul.f32 -0.60714287, %v1805_v21  ;;  %v470_v3 = vmul.f32 -0.60714287, %v1803_v20  ;;  %v573_v4 = vmul.f32 -0.60714287, %v1795_v17 }
  0x36   : > { %v1935_v11 = vmul.f32 -0.010714286, %v1779_v8  ;;  %s1562_s17 = sshll.u32 (%p1757_p6), %s1402_s23, 3 }
  0x37   : > { %s1404_s26 = scalar_lea.vmem (%p1757_p6), %s2609_s1, %s1562_s17 }
  0x39   : > { %427 = vrot.lane.b32.xlu1 %v422_v22, %s1695_s15  ;;  %425 = vrot.lane.b32.xlu0 %v421_v23, %s1695_s15 }
  0x3d   : > { %241 = vrot.lane.b32.xlu1 %v1818_v27, %s1696_s16  ;;  %239 = vrot.lane.b32.xlu0 %v1821_v28, %s1696_s16 }
  0x41   : > { %435 = vrot.lane.b32.xlu1 %v410_v18, %s1696_s16  ;;  %433 = vrot.lane.b32.xlu0 %v409_v19, %s1696_s16 }
  0x45   : > { %445 = vrot.lane.b32.xlu1 %v1838_v35, %s1696_s16  ;;  %443 = vrot.lane.b32.xlu0 %v1841_v36, %s1696_s16 }
  0x49   : > { %317 = vrot.lane.b32.xlu1 %v312_v40, %s1695_s15  ;;  %315 = vrot.lane.b32.xlu0 %v311_v41, %s1695_s15  ;;  %v1957_v40 = vmul.f32 -0.010714286, %v1787_v13 }
  0x4d   : > { %327 = vrot.lane.b32.xlu1 %v308_v24, %s1695_s15  ;;  %325 = vrot.lane.b32.xlu0 %v307_v29, %s1695_s15 }
  0x51   : > { %521 = vrot.lane.b32.xlu1 %v516_v42, %s1695_s15  ;;  %519 = vrot.lane.b32.xlu0 %v515_v43, %s1695_s15  ;;  %v1962_v42 = vmul.f32 -0.010714286, %v1783_v10  ;;  %v1965_v43 = vmul.f32 0.05357143, %v1803_v20 }
  0x55   : > { %337 = vrot.lane.b32.xlu1 %v306_v25, %s1696_s16  ;;  %335 = vrot.lane.b32.xlu0 %v305_v30, %s1696_s16 }
  0x59   : > { %531 = vrot.lane.b32.xlu1 %v512_v32, %s1695_s15  ;;  %529 = vrot.lane.b32.xlu0 %v511_v37, %s1695_s15 }
  0x5d   : > { %541 = vrot.lane.b32.xlu1 %v510_v33, %s1696_s16  ;;  %539 = vrot.lane.b32.xlu0 %v509_v38, %s1696_s16  ;;  %v1944_v33 = vmul.f32 -0.60714287, %v1793_v16  ;;  %v1954_v38 = vmul.f32 -0.010714286, %v1805_v21 }
  0x61   : > { %351 = vrot.lane.b32.xlu0 %v1868_v44, %s1695_s15  ;;  %349 = vrot.lane.b32.xlu1 %v345_v45, %s1695_s15 }
  0x65   : > { %259 = vrot.lane.b32.xlu0 %v254_v46, %s1695_s15  ;;  %257 = vrot.lane.b32.xlu1 %v253_v47, %s1695_s15 }
  0x69   : > { %363 = vrot.lane.b32.xlu0 %v358_v48, %s1695_s15  ;;  %361 = vrot.lane.b32.xlu1 %v357_v49, %s1695_s15 }
  0x6d   : > { %555 = vrot.lane.b32.xlu0 %v1882_v50, %s1695_s15  ;;  %553 = vrot.lane.b32.xlu1 %v549_v51, %s1695_s15 }
  0x71   : > { %271 = vrot.lane.b32.xlu0 %v266_v52, %s1695_s15  ;;  %269 = vrot.lane.b32.xlu1 %v265_v53, %s1695_s15 }
  0x75   : > { %375 = vrot.lane.b32.xlu0 %v370_v54, %s1696_s16  ;;  %373 = vrot.lane.b32.xlu1 %v369_v55, %s1696_s16 }
  0x79   : > { %463 = vrot.lane.b32.xlu0 %v1901_v60, %s1695_s15  ;;  %461 = vrot.lane.b32.xlu1 %v457_v61, %s1695_s15 }
  0x7d   : > { %567 = vrot.lane.b32.xlu0 %v1912_v0, %s1695_s15  ;;  %565 = vrot.lane.b32.xlu1 %v561_v1, %s1695_s15 }
  0x81   : > { %279 = vrot.lane.b32.xlu0 %v254_v46, %s1696_s16  ;;  %277 = vrot.lane.b32.xlu1 %v253_v47, %s1696_s16 }
  0x85   : > { %383 = vrot.lane.b32.xlu0 %v358_v48, %s1696_s16  ;;  %381 = vrot.lane.b32.xlu1 %v357_v49, %s1696_s16 }
  0x89   : > { %473 = vrot.lane.b32.xlu1 %v469_v2, %s1695_s15  ;;  %475 = vrot.lane.b32.xlu0 %v470_v3, %s1695_s15 }
  0x8d   : > { %577 = vrot.lane.b32.xlu1 %v573_v4, %s1696_s16 }
  0x91   : > { %287 = vrot.lane.b32.xlu1 %v249_v56, %s1696_s16 }
  0x95   : > { %389 = vrot.lane.b32.xlu1 %v345_v45, %s1697_s18  ;;  %v1968_v45 = vmul.f32 -0.010714286, %v1803_v20 }
  0x99   : > { %481 = vrot.lane.b32.xlu1 %v457_v61, %s1696_s16 }
  0x9b   : > { %v222_v5 = vpop.permute.xlu1 %221  ;;  %v210_v6 = vpop.permute.xlu0 %209 }
  0x9c   : > { %v215_v18 = vadd.f32 %v210_v6, %v1821_v28 }
  0x9d   : > { %585 = vrot.lane.b32.xlu1 %v561_v1, %s1696_s16 }
  0x9e   : > { %v227_v25 = vadd.f32 %v222_v5, %v215_v18 }
  0x9f   : > { %v224_v7 = vpop.permute.xlu1 %223  ;;  %v212_v9 = vpop.permute.xlu0 %211 }
  0xa0   : > { %v216_v19 = vadd.f32 %v212_v9, %v1818_v27  ;;  %v1947_v27 = vmul.f32 0.05357143, %v1783_v10 }
  0xa1   : > { %297 = vrot.lane.b32.xlu1 %v247_v57, %s1697_s18 }
  0xa2   : > { %v228_v24 = vadd.f32 %v224_v7, %v216_v19 }
  0xa3   : > { %v416_v12 = vpop.permute.xlu1 %415  ;;  %v414_v14 = vpop.permute.xlu0 %413 }
  0xa4   : > { %v420_v41 = vadd.f32 %v416_v12, %v1838_v35  ;;  %v419_v46 = vadd.f32 %v414_v14, %v1841_v36 }
  0xa5   : > { %399 = vrot.lane.b32.xlu1 %v1935_v11, %s1697_s18 }
  0xa7   : > { %v232_v15 = vpop.permute.xlu1 %231  ;;  %v230_v17 = vpop.permute.xlu0 %229 }
  0xa8   : > { %v236_v8 = vadd.f32 %v232_v15, %v228_v24  ;;  %v235_v29 = vadd.f32 %v230_v17, %v227_v25 }
  0xa9   : > { %491 = vrot.lane.b32.xlu1 %v453_v58, %s1696_s16 }
  0xab   : > { %v428_v22 = vpop.permute.xlu1 %427  ;;  %v426_v23 = vpop.permute.xlu0 %425 }
  0xac   : > { %v432_v35 = vadd.f32 %v428_v22, %v420_v41  ;;  %v431_v52 = vadd.f32 %v426_v23, %v419_v46 }
  0xad   : > { %593 = vrot.lane.b32.xlu1 %v549_v51, %s1697_s18  ;;  %v1977_v51 = vadd.f32 %v1947_v27, %v1957_v40 }
  0xaf   : > { %v242_v30 = vpop.permute.xlu1 %241  ;;  %v240_v32 = vpop.permute.xlu0 %239 }
  0xb0   : > { %v1949_v28 = vadd.f32 %v242_v30, %v236_v8  ;;  %v1951_v37 = vadd.f32 %v240_v32, %v235_v29 }
  0xb1   : > { %501 = vrot.lane.b32.xlu1 %v451_v59, %s1697_s18 }
  0xb2   : > { %v833_v21 = vmul.f32 0.05357143, %v1951_v37  ;;  %v834_v13 = vmul.f32 0.05357143, %v1949_v28  ;;  %v851_v47 = vmul.f32 -0.60714287, %v1951_v37 }
  0xb3   : > { %v436_v48 = vpop.permute.xlu1 %435  ;;  %v434_v49 = vpop.permute.xlu0 %433  ;;  %v852_v10 = vmul.f32 -0.60714287, %v1949_v28  ;;  %v750_v20 = vmul.f32 0.2607143, %v1951_v37  ;;  %v747_v54 = vmul.f32 -0.010714286, %v1951_v37 }
  0xb4   : > { %v837_v53 = vrot.slane %v833_v21, 1  ;;  %v838_v36 = vrot.slane %v834_v13, 1  ;;  %v855_v55 = vrot.slane %v851_v47, 2  ;;  %v865_v57 = vrot.slane %v833_v21, 3 }
  0xb5   : > { %v856_v56 = vrot.slane %v852_v10, 2  ;;  %v866_v58 = vrot.slane %v834_v13, 3  ;;  %603 = vrot.lane.b32.xlu1 %v1954_v38, %s1697_s18  ;;  %v440_v59 = vadd.f32 %v436_v48, %v432_v35  ;;  %v439_v61 = vadd.f32 %v434_v49, %v431_v52 }
  0xb6   : > { %v751_v1 = vmul.f32 0.2607143, %v1949_v28  ;;  %v754_v2 = vrot.slane %v750_v20, 1  ;;  %v839_v5 = vsel %vm616_vm0, %v837_v53, %v838_v36  ;;  %v768_v7 = vrot.slane %v750_v20, 2 }
  0xb7   : > { %v446_v3 = vpop.permute.xlu1 %445  ;;  %v444_v4 = vpop.permute.xlu0 %443  ;;  %v857_v6 = vsel %vm631_vm1, %v855_v55, %v856_v56  ;;  %v781_v9 = vmul.f32 -0.010714286, %v1949_v28  ;;  %v867_v18 = vsel %vm784_vm2, %v865_v57, %v866_v58  ;;  %v785_v19 = vrot.slane %v747_v54, 3 }
  0xb8   : > { %v1987_v12 = vadd.f32 %v446_v3, %v440_v59  ;;  %v1989_v14 = vadd.f32 %v444_v4, %v439_v61  ;;  %v755_v15 = vrot.slane %v751_v1, 1  ;;  %v769_v17 = vrot.slane %v751_v1, 2 }
  0xb9   : > { %v786_v22 = vrot.slane %v781_v9, 3  ;;  %v1993_v23 = vmul.f32 0.25, %v1951_v37  ;;  %v613_v13 = vmul.f32 0.25, %v1949_v28  ;;  %v2006_v53 = vmul.f32 -0.05, %v1951_v37 }
  0xba   : > { %v832_v24 = vmul.f32 -0.010714286, %v1989_v14  ;;  %v842_v25 = vmul.f32 0.2607143, %v1989_v14  ;;  %v843_v8 = vmul.f32 0.2607143, %v1987_v12  ;;  %v756_v29 = vsel %vm616_vm0, %v754_v2, %v755_v15 }
  0xbb   : > { %v318_v30 = vpop.permute.xlu1 %317  ;;  %v316_v32 = vpop.permute.xlu0 %315  ;;  %v748_v41 = vmul.f32 0.05357143, %v1989_v14  ;;  %v759_v46 = vmul.f32 -0.60714287, %v1989_v14  ;;  %v770_v21 = vsel %vm631_vm1, %v768_v7, %v769_v17  ;;  %v870_v49 = vmul.f32 -0.010714286, %v1987_v12 }
  0xbc   : > { %v322_v47 = vadd.f32 %v318_v30, %v1813_v26  ;;  %v841_v35 = vadd.f32 %v839_v5, %v832_v24  ;;  %v846_v48 = vrot.slane %v842_v25, 1  ;;  %v847_v10 = vrot.slane %v843_v8, 1 }
  0xbd   : > { %v860_v20 = vrot.slane %v842_v25, 2  ;;  %v861_v52 = vrot.slane %v843_v8, 2  ;;  %v321_v36 = vadd.f32 %v316_v32, %v1825_v31  ;;  %v873_v55 = vrot.slane %v832_v24, 3 }
  0xbe   : > { %v749_v56 = vadd.f32 %v748_v41, %v747_v54  ;;  %v760_v57 = vmul.f32 -0.60714287, %v1987_v12  ;;  %v848_v26 = vsel %vm616_vm0, %v846_v48, %v847_v10  ;;  %v763_v61 = vrot.slane %v759_v46, 1 }
  0xbf   : > { %v328_v58 = vpop.permute.xlu1 %327  ;;  %v326_v59 = vpop.permute.xlu0 %325  ;;  %v773_v1 = vmul.f32 0.05357143, %v1987_v12  ;;  %v776_v2 = vrot.slane %v748_v41, 2  ;;  %v850_v4 = vadd.f32 %v848_v26, %v841_v35  ;;  %v862_v5 = vsel %vm631_vm1, %v860_v20, %v861_v52 }
  0xc0   : > { %v332_v3 = vadd.f32 %v328_v58, %v322_v47  ;;  %v874_v7 = vrot.slane %v870_v49, 3  ;;  %v758_v9 = vadd.f32 %v756_v29, %v749_v56  ;;  %v764_v15 = vrot.slane %v760_v57, 1 }
  0xc1   : > { %v777_v31 = vrot.slane %v773_v1, 2  ;;  %v787_v54 = vsel %vm784_vm2, %v785_v19, %v786_v22  ;;  %v859_v17 = vadd.f32 %v857_v6, %v850_v4  ;;  %v2015_v24 = vmul.f32 -0.05, %v1989_v14 }
  0xc2   : > { %v617_v25 = vrot.slane %v1993_v23, 1  ;;  %v618_v8 = vrot.slane %v613_v13, 1  ;;  %v765_v41 = vsel %vm616_vm0, %v763_v61, %v764_v15  ;;  %v622_v47 = vmul.f32 0.5, %v1989_v14 }
  0xc3   : > { %v522_v30 = vpop.permute.xlu1 %521  ;;  %v520_v32 = vpop.permute.xlu0 %519  ;;  %v778_v46 = vsel %vm631_vm1, %v776_v2, %v777_v31  ;;  %v623_v29 = vmul.f32 0.5, %v1987_v12  ;;  %v331_v35 = vadd.f32 %v326_v59, %v321_v36  ;;  %v864_v48 = vadd.f32 %v862_v5, %v859_v17 }
  0xc4   : > { %v875_v6 = vsel %vm784_vm2, %v873_v55, %v874_v7  ;;  %v767_v19 = vadd.f32 %v765_v41, %v758_v9  ;;  %v619_v22 = vsel %vm616_vm0, %v617_v25, %v618_v8  ;;  %v626_v49 = vrot.slane %v622_v47, 1 }
  0xc5   : > { %v627_v10 = vrot.slane %v623_v29, 1  ;;  %v632_v20 = vrot.slane %v1993_v23, 2  ;;  %v869_v52 = vadd.f32 %v867_v18, %v864_v48  ;;  %v621_v57 = vadd.f32 %v619_v22, %v2015_v24 }
  0xc6   : > { %v772_v56 = vadd.f32 %v770_v21, %v767_v19  ;;  %v633_v58 = vrot.slane %v613_v13, 2  ;;  %v526_v26 = vadd.f32 %v522_v30, %v1833_v34  ;;  %v525_v61 = vadd.f32 %v520_v32, %v1845_v39 }
  0xc7   : > { %v338_v36 = vpop.permute.xlu1 %337  ;;  %v336_v59 = vpop.permute.xlu0 %335  ;;  %v628_v55 = vsel %vm616_vm0, %v626_v49, %v627_v10  ;;  %v2030_v1 = vmul.f32 -0.05, %v1987_v12  ;;  %v877_v18 = vadd.f32 %v875_v6, %v869_v52  ;;  %v640_v34 = vrot.slane %v2015_v24, 2 }
  0xc8   : > { %v2032_v2 = vadd.f32 %v338_v36, %v332_v3  ;;  %v2034_v4 = vadd.f32 %v336_v59, %v331_v35  ;;  %v780_v23 = vadd.f32 %v778_v46, %v772_v56  ;;  %v630_v21 = vadd.f32 %v628_v55, %v621_v57 }
  0xc9   : > { %v634_v13 = vsel %vm631_vm1, %v632_v20, %v633_v58  ;;  %v641_v39 = vrot.slane %v2030_v1, 2  ;;  %1265 = vrot.lane.b32.xlu0 %v877_v18, %s1698_s19  ;;  %v2049_v30 = vmul.f32 0.25, %v1989_v14 }
  0xca   : > { %v879_v5 = vmul.f32 0.05357143, %v2034_v4  ;;  %v880_v7 = vmul.f32 0.05357143, %v2032_v2  ;;  %v897_v3 = vmul.f32 -0.60714287, %v2034_v4  ;;  %v2042_v9 = vadd.f32 %v787_v54, %v780_v23 }
  0xcb   : > { %v532_v15 = vpop.permute.xlu1 %531  ;;  %v530_v31 = vpop.permute.xlu0 %529  ;;  %v898_v17 = vmul.f32 -0.60714287, %v2032_v2  ;;  %v793_v25 = vmul.f32 0.2607143, %v2034_v4  ;;  %v2046_v8 = vadd.f32 %v634_v13, %v630_v21  ;;  %v790_v19 = vmul.f32 -0.010714286, %v2034_v4 }
  0xcc   : > { %v536_v32 = vadd.f32 %v532_v15, %v526_v26  ;;  %v535_v41 = vadd.f32 %v530_v31, %v525_v61  ;;  %v883_v46 = vrot.slane %v879_v5, 1  ;;  %v884_v47 = vrot.slane %v880_v7, 1 }
  0xcd   : > { %v901_v29 = vrot.slane %v897_v3, 2  ;;  %v902_v35 = vrot.slane %v898_v17, 2  ;;  %v911_v48 = vrot.slane %v879_v5, 3  ;;  %v912_v54 = vrot.slane %v880_v7, 3  ;;  %579 = vrot.lane.b32.xlu0 %v1944_v33, %s1696_s16 }
  0xce   : > { %v885_v6 = vsel %vm616_vm0, %v883_v46, %v884_v47  ;;  %v794_v22 = vmul.f32 0.2607143, %v2032_v2  ;;  %v797_v49 = vrot.slane %v793_v25, 1  ;;  %v811_v56 = vrot.slane %v793_v25, 2 }
  0xcf   : > { %v542_v14 = vpop.permute.xlu1 %541  ;;  %v540_v10 = vpop.permute.xlu0 %539  ;;  %v903_v20 = vsel %vm631_vm1, %v901_v29, %v902_v35  ;;  %v2058_v52 = vsel %vm784_vm2, %v911_v48, %v912_v54  ;;  %v824_v57 = vmul.f32 -0.010714286, %v2032_v2  ;;  %v827_v36 = vrot.slane %v790_v19, 3 }
  0xd0   : > { %v2061_v58 = vadd.f32 %v542_v14, %v536_v32  ;;  %v2063_v33 = vadd.f32 %v540_v10, %v535_v41  ;;  %v798_v26 = vrot.slane %v794_v22, 1  ;;  %v812_v61 = vrot.slane %v794_v22, 2 }
  0xd1   : > { %v828_v59 = vrot.slane %v824_v57, 3  ;;  %v2066_v55 = vmul.f32 0.25, %v2034_v4  ;;  %v2069_v18 = vmul.f32 0.25, %v2032_v2  ;;  %289 = vrot.lane.b32.xlu0 %v1947_v27, %s1696_s16 }
  0xd2   : > { %v878_v23 = vmul.f32 -0.010714286, %v2063_v33  ;;  %v888_v21 = vmul.f32 0.2607143, %v2063_v33  ;;  %v889_v13 = vmul.f32 0.2607143, %v2061_v58  ;;  %v799_v5 = vsel %vm616_vm0, %v797_v49, %v798_v26 }
  0xd3   : > { %v916_v7 = vmul.f32 -0.010714286, %v2061_v58  ;;  %v352_v3 = vpop.permute.xlu0 %351  ;;  %v350_v15 = vpop.permute.xlu1 %349  ;;  %v791_v31 = vmul.f32 0.05357143, %v2063_v33  ;;  %v802_v17 = vmul.f32 -0.60714287, %v2063_v33  ;;  %v813_v25 = vsel %vm631_vm1, %v811_v56, %v812_v61 }
  0xd4   : > { %v887_v32 = vadd.f32 %v885_v6, %v878_v23  ;;  %v892_v27 = vrot.slane %v888_v21, 1  ;;  %v893_v41 = vrot.slane %v889_v13, 1  ;;  %v906_v46 = vrot.slane %v888_v21, 2 }
  0xd5   : > { %v907_v47 = vrot.slane %v889_v13, 2  ;;  %v919_v29 = vrot.slane %v878_v23, 3  ;;  %v920_v35 = vrot.slane %v916_v7, 3  ;;  %v356_v48 = vadd.f32 %v352_v3, %v1962_v42  ;;  %391 = vrot.lane.b32.xlu0 %v1868_v44, %s1697_s18 }
  0xd6   : > { %v894_v54 = vsel %vm616_vm0, %v892_v27, %v893_v41  ;;  %v355_v22 = vadd.f32 %v350_v15, %v1935_v11  ;;  %v792_v49 = vadd.f32 %v791_v31, %v790_v19  ;;  %v803_v14 = vmul.f32 -0.60714287, %v2061_v58 }
  0xd7   : > { %v896_v10 = vadd.f32 %v894_v54, %v887_v32  ;;  %v908_v6 = vsel %vm631_vm1, %v906_v46, %v907_v47  ;;  %v921_v56 = vsel %vm784_vm2, %v919_v29, %v920_v35  ;;  %v260_v57 = vpop.permute.xlu0 %259  ;;  %v258_v26 = vpop.permute.xlu1 %257  ;;  %v806_v61 = vrot.slane %v802_v17, 1 }
  0xd8   : > { %v2090_v23 = vadd.f32 %v258_v26, %v1905_v62  ;;  %v801_v21 = vadd.f32 %v799_v5, %v792_v49  ;;  %v807_v44 = vrot.slane %v803_v14, 1  ;;  %v2093_v13 = vmul.f32 -0.05, %v2034_v4 }
  0xd9   : > { %v905_v11 = vadd.f32 %v903_v20, %v896_v10  ;;  %v816_v19 = vmul.f32 0.05357143, %v2061_v58  ;;  %v819_v7 = vrot.slane %v791_v31, 2  ;;  %v829_v3 = vsel %vm784_vm2, %v827_v36, %v828_v59  ;;  %483 = vrot.lane.b32.xlu0 %v1901_v60, %s1696_s16 }
  0xda   : > { %v808_v15 = vsel %vm616_vm0, %v806_v61, %v807_v44  ;;  %v645_v17 = vmul.f32 -0.05, %v2063_v33  ;;  %v650_v62 = vrot.slane %v2066_v55, 1  ;;  %v651_v5 = vrot.slane %v2069_v18, 1 }
  0xdb   : > { %v910_v32 = vadd.f32 %v908_v6, %v905_v11  ;;  %v364_v27 = vpop.permute.xlu0 %363  ;;  %v362_v41 = vpop.permute.xlu1 %361  ;;  %v810_v20 = vadd.f32 %v808_v15, %v801_v21  ;;  %v820_v46 = vrot.slane %v816_v19, 2  ;;  %v655_v31 = vmul.f32 0.5, %v2063_v33 }
  0xdc   : > { %v368_v47 = vadd.f32 %v364_v27, %v356_v48  ;;  %v2104_v36 = vadd.f32 %v362_v41, %v355_v22  ;;  %v652_v60 = vsel %vm616_vm0, %v650_v62, %v651_v5  ;;  %v656_v59 = vmul.f32 0.5, %v2061_v58 }
  0xdd   : > { %v915_v29 = vadd.f32 %v2058_v52, %v910_v32  ;;  %v815_v35 = vadd.f32 %v813_v25, %v810_v20  ;;  %v821_v54 = vsel %vm631_vm1, %v819_v7, %v820_v46  ;;  %v654_v49 = vadd.f32 %v652_v60, %v645_v17  ;;  %587 = vrot.lane.b32.xlu0 %v1912_v0, %s1696_s16 }
  0xde   : > { %v659_v14 = vrot.slane %v655_v31, 1  ;;  %v660_v10 = vrot.slane %v656_v59, 1  ;;  %v664_v6 = vrot.slane %v2066_v55, 2  ;;  %v665_v48 = vrot.slane %v2069_v18, 2 }
  0xdf   : > { %v923_v22 = vadd.f32 %v921_v56, %v915_v29  ;;  %v556_v26 = vpop.permute.xlu0 %555  ;;  %v2114_v61 = vpop.permute.xlu1 %553  ;;  %v823_v21 = vadd.f32 %v821_v54, %v815_v35  ;;  %v669_v52 = vmul.f32 -0.05, %v2061_v58  ;;  %v672_v25 = vrot.slane %v645_v17, 2 }
  0xe0   : > { %v264_v44 = vadd.f32 %v260_v57, %v1977_v51  ;;  %v2119_v11 = vadd.f32 %v556_v26, %v1968_v45  ;;  %v661_v0 = vsel %vm616_vm0, %v659_v14, %v660_v10  ;;  %v666_v19 = vsel %vm631_vm1, %v664_v6, %v665_v48 }
  0xe1   : > { %1259 = vrot.lane.b32.xlu1 %v923_v22, %s1695_s15  ;;  %v2124_v55 = vadd.f32 %v829_v3, %v823_v21  ;;  %v663_v18 = vadd.f32 %v661_v0, %v654_v49  ;;  %v673_v56 = vrot.slane %v669_v52, 2  ;;  %v713_v7 = vmul.f32 -0.05, %v2032_v2  ;;  %299 = vrot.lane.b32.xlu0 %v1957_v40, %s1697_s18 }
  0xe2   : > { %v714_v51 = vmul.f32 0.25, %v2063_v33  ;;  %v715_v57 = vmul.f32 0.25, %v2061_v58  ;;  %v718_v15 = vmul.f32 0.5, %v2034_v4  ;;  %v719_v17 = vmul.f32 0.5, %v2032_v2 }
  0xe3   : > { %v272_v62 = vpop.permute.xlu0 %271  ;;  %v2133_v5 = vpop.permute.xlu1 %269  ;;  %v668_v3 = vadd.f32 %v666_v19, %v663_v18  ;;  %v674_v32 = vsel %vm631_vm1, %v672_v25, %v673_v56  ;;  %v740_v27 = vrot.slane %v2093_v13, 2  ;;  %v741_v41 = vrot.slane %v713_v7, 2 }
  0xe4   : > { %v2137_v20 = vadd.f32 %v272_v62, %v264_v44  ;;  %v716_v40 = vadd.f32 %v714_v51, %v2093_v13  ;;  %v717_v33 = vadd.f32 %v715_v57, %v713_v7  ;;  %v678_v58 = vmul.f32 -0.05, %v1949_v28 }
  0xe5   : > { %v2141_v46 = vadd.f32 %v674_v32, %v668_v3  ;;  %v722_v4 = vrot.slane %v718_v15, 1  ;;  %v723_v2 = vrot.slane %v719_v17, 1  ;;  %v731_v31 = vrot.slane %v714_v51, 1  ;;  %401 = vrot.lane.b32.xlu0 %v1962_v42, %s1697_s18 }
  0xe6   : > { %v732_v60 = vrot.slane %v715_v57, 1  ;;  %v742_v59 = vsel %vm631_vm1, %v740_v27, %v741_v41  ;;  %v642_v13 = vsel %vm631_vm1, %v640_v34, %v641_v39  ;;  %v680_v29 = vmul.f32 0.25, %v1987_v12 }
  0xe7   : > { %v376_v35 = vpop.permute.xlu0 %375  ;;  %v374_v54 = vpop.permute.xlu1 %373  ;;  %v724_v49 = vsel %vm616_vm0, %v722_v4, %v723_v2  ;;  %v728_v14 = vadd.f32 %v723_v2, %v717_v33  ;;  %v2154_v10 = vadd.f32 %v642_v13, %v2046_v8  ;;  %v681_v42 = vadd.f32 %v2049_v30, %v2006_v53 }
  0xe8   : > { %v2158_v6 = vadd.f32 %v376_v35, %v368_v47  ;;  %v727_v1 = vadd.f32 %v724_v49, %v716_v40  ;;  %v733_v24 = vsel %vm616_vm0, %v731_v31, %v732_v60  ;;  %v682_v34 = vadd.f32 %v680_v29, %v678_v58 }
  0xe9   : > { %v737_v48 = vadd.f32 %v732_v60, %v728_v14  ;;  %v683_v12 = vmul.f32 0.5, %v1951_v37  ;;  %v684_v39 = vmul.f32 0.5, %v1949_v28  ;;  %493 = vrot.lane.b32.xlu0 %v1965_v43, %s1696_s16  ;;  %v696_v8 = vrot.slane %v2049_v30, 1 }
  0xea   : > { %v736_v22 = vadd.f32 %v733_v24, %v727_v1  ;;  %v697_v26 = vrot.slane %v680_v29, 1  ;;  %v705_v21 = vrot.slane %v2006_v53, 2  ;;  %v706_v0 = vrot.slane %v678_v58, 2 }
  0xeb   : > { %v462_v47 = vpop.permute.xlu1 %461  ;;  %v746_v52 = vadd.f32 %v741_v41, %v737_v48  ;;  %v687_v25 = vrot.slane %v683_v12, 1  ;;  %v688_v44 = vrot.slane %v684_v39, 1  ;;  %v2173_v30 = vmul.f32 -0.010714286, %v1793_v16 }
  0xec   : > { %v745_v19 = vadd.f32 %v742_v59, %v736_v22  ;;  %v698_v18 = vsel %vm616_vm0, %v696_v8, %v697_v26  ;;  %v707_v7 = vsel %vm631_vm1, %v705_v21, %v706_v0  ;;  %v275_v13 = vadd.f32 %v2133_v5, %v2090_v23  ;;  %v464_v23 = vpop.permute.xlu0 %463 }
  0xed   : > { %v1249_v37 = vrot.slane %v746_v52, 1  ;;  %v689_v28 = vsel %vm616_vm0, %v687_v25, %v688_v44  ;;  %v693_v56 = vadd.f32 %v688_v44, %v682_v34  ;;  %595 = vrot.lane.b32.xlu0 %v1882_v50, %s1697_s18  ;;  %v467_v29 = vadd.f32 %v462_v47, %v1907_v63 }
  0xee   : > { %v1248_v53 = vrot.slane %v745_v19, 1  ;;  %v692_v51 = vadd.f32 %v689_v28, %v681_v42  ;;  %v559_v35 = vadd.f32 %v2114_v61, %v1954_v38  ;;  %v379_v42 = vadd.f32 %v374_v54, %v2104_v36 }
  0xef   : > { %v566_v57 = vpop.permute.xlu1 %565  ;;  %v702_v15 = vadd.f32 %v697_v26, %v693_v56 }
  0xf0   : > { %v2176_v17 = vsel %vm616_vm0, %v1248_v53, %v1249_v37  ;;  %v701_v62 = vadd.f32 %v698_v18, %v692_v51  ;;  %v571_v1 = vadd.f32 %v566_v57, %v559_v35  ;;  %v568_v44 = vpop.permute.xlu0 %567 }
  0xf1   : > { %v711_v3 = vadd.f32 %v706_v0, %v702_v15  ;;  %503 = vrot.lane.b32.xlu0 %v2173_v30, %s1697_s18 }
  0xf2   : > { %v710_v32 = vadd.f32 %v707_v7, %v701_v62 }
  0xf3   : > { %v278_v27 = vpop.permute.xlu1 %277  ;;  %v1242_v41 = vrot.slane %v711_v3, 1 }
  0xf4   : > { %v1241_v40 = vrot.slane %v710_v32, 1  ;;  %v283_v49 = vadd.f32 %v278_v27, %v275_v13  ;;  %v280_v51 = vpop.permute.xlu0 %279 }
  0xf5   : > { %605 = vrot.lane.b32.xlu0 %v1968_v45, %s1697_s18 }
  0xf6   : > { %v2183_v16 = vsel %vm616_vm0, %v1241_v40, %v1242_v41 }
  0xf7   : > { %v382_v50 = vpop.permute.xlu1 %381 }
  0xf8   : > { %v387_v12 = vadd.f32 %v382_v50, %v379_v42  ;;  %v384_v62 = vpop.permute.xlu0 %383 }
  0xf9   : > { %v388_v35 = vadd.f32 %v384_v62, %v2158_v6 }
  0xfb   : > { %v474_v33 = vpop.permute.xlu1 %473 }
  0xfc   : > { %v479_v14 = vadd.f32 %v474_v33, %v467_v29  ;;  %v476_v3 = vpop.permute.xlu0 %475  ;;  %v572_v29 = vadd.f32 %v568_v44, %v2119_v11 }
  0xff   : > { %v578_v58 = vpop.permute.xlu1 %577 }
 0x100   : > { %v583_v39 = vadd.f32 %v578_v58, %v571_v1 }
 0x103   : > { %v288_v4 = vpop.permute.xlu1 %287 }
 0x104   : > { %v293_v48 = vadd.f32 %v288_v4, %v283_v49 }
 0x107   : > { %v390_v2 = vpop.permute.xlu1 %389 }
 0x108   : > { %v395_v5 = vadd.f32 %v390_v2, %v387_v12  ;;  %v456_v2 = vadd.f32 %v1965_v43, %v2173_v30  ;;  %v284_v30 = vadd.f32 %v280_v51, %v2137_v20 }
 0x10b   : > { %v482_v31 = vpop.permute.xlu1 %481 }
 0x10c   : > { %v487_v34 = vadd.f32 %v482_v31, %v479_v14 }
 0x10f   : > { %v586_v60 = vpop.permute.xlu1 %585 }
 0x110   : > { %v591_v63 = vadd.f32 %v586_v60, %v583_v39  ;;  %v468_v60 = vadd.f32 %v464_v23, %v456_v2 }
 0x112   : > { %v2256_v14 = vadd.f32 %v476_v3, %v468_v60 }
 0x113   : > { %v298_v59 = vpop.permute.xlu1 %297 }
 0x114   : > { %v303_v8 = vadd.f32 %v298_v59, %v293_v48 }
 0x116   : > { %v2191_v47 = vmul.f32 -0.05, %v303_v8  ;;  %v2195_v61 = vmul.f32 -0.010714286, %v303_v8  ;;  %v2239_v59 = vmul.f32 0.25, %v303_v8 }
 0x117   : > { %v400_v45 = vpop.permute.xlu1 %399  ;;  %v2248_v43 = vmul.f32 0.2607143, %v303_v8  ;;  %v2254_v49 = vmul.f32 -0.60714287, %v303_v8 }
 0x118   : > { %v405_v36 = vadd.f32 %v400_v45, %v395_v5  ;;  %v2252_v45 = vmul.f32 0.05357143, %v303_v8  ;;  %v943_v11 = vrot.slane %v2239_v59, 2  ;;  %v1016_v20 = vrot.slane %v2191_v47, 2 }
 0x11a   : > { %v2211_v37 = vmul.f32 -0.05, %v405_v36  ;;  %v2215_v56 = vmul.f32 -0.010714286, %v405_v36  ;;  %v2261_v42 = vmul.f32 0.5, %v405_v36 }
 0x11b   : > { %v492_v24 = vpop.permute.xlu1 %491  ;;  %v2273_v39 = vmul.f32 0.05357143, %v405_v36  ;;  %v2278_v23 = vmul.f32 -0.60714287, %v405_v36 }
 0x11c   : > { %v497_v26 = vadd.f32 %v492_v24, %v487_v34  ;;  %v2266_v24 = vmul.f32 0.2607143, %v405_v36 }
 0x11f   : > { %v594_v22 = vpop.permute.xlu1 %593 }
 0x120   : > { %v599_v54 = vadd.f32 %v594_v22, %v591_v63 }
 0x123   : > { %v502_v21 = vpop.permute.xlu1 %501 }
 0x124   : > { %v2193_v38 = vadd.f32 %v502_v21, %v497_v26 }
 0x126   : > { %v2198_v52 = vmul.f32 0.25, %v2193_v38  ;;  %v2201_v25 = vmul.f32 0.05357143, %v2193_v38  ;;  %v2289_v51 = vmul.f32 -0.60714287, %v2193_v38 }
 0x127   : > { %v604_v18 = vpop.permute.xlu1 %603  ;;  %v2292_v62 = vmul.f32 0.2607143, %v2193_v38 }
 0x128   : > { %v2205_v0 = vadd.f32 %v2198_v52, %v2191_v47  ;;  %v2209_v19 = vadd.f32 %v2201_v25, %v2195_v61  ;;  %v2213_v28 = vadd.f32 %v604_v18, %v599_v54  ;;  %v2284_v54 = vmul.f32 0.5, %v2193_v38 }
 0x12a   : > { %v2218_v7 = vmul.f32 0.25, %v2213_v28  ;;  %v2221_v53 = vmul.f32 0.05357143, %v2213_v28  ;;  %v2317_v21 = vmul.f32 -0.05, %v2213_v28 }
 0x12b   : > { %v2325_v18 = vmul.f32 -0.010714286, %v2213_v28 }
 0x12c   : > { %v2225_v57 = vadd.f32 %v2218_v7, %v2211_v37  ;;  %v2229_v15 = vadd.f32 %v2221_v53, %v2215_v56 }
 0x13b   : > { %v1266_v32 = vpop.permute.xlu0 %1265 }
 0x13c   : > { %v1268_v27 = vadd.f32 %v1266_v32, %v2124_v55  ;;  %v1272_v41 = vsub.f32 %v2124_v55, %v1266_v32  ;;  %v2245_v55 = vmul.f32 0.5, %v303_v8 }
 0x13e   : > { %v1269_v40 = vmul.f32 0.70710677, %v1268_v27  ;;  %v1273_v50 = vmul.f32 0.70710677, %v1272_v41  ;;  %v998_v1 = vrot.slane %v2245_v55, 1  ;;  %v2614_v55 = vrot.slane %v2248_v43, 2 }
 0x13f   : > { %v2233_v33 = vpop.permute.xlu0 %579  ;;  %v2298_v41 = vmul.f32 -0.05, %v2193_v38 }
 0x140   : > { %v1275_v58 = vmul.f32 %v1269_v40, %v1269_v40  ;;  %v1293_v4 = vmul.f32 %v1273_v50, %v1273_v50  ;;  %v584_v27 = vadd.f32 %v2233_v33, %v572_v29  ;;  %v2328_v40 = vmul.f32 0.2607143, %v2213_v28 }
 0x142   : > { %1277 = vrot.lane.b32.xlu0 %v1275_v58, %s1695_s15  ;;  %1295 = vrot.lane.b32.xlu1 %v1293_v4, %s1695_s15  ;;  %v2303_v58 = vmul.f32 -0.010714286, %v2193_v38  ;;  %v2306_v4 = vmul.f32 0.5, %v2213_v28 }
 0x143   : > { %v290_v31 = vpop.permute.xlu0 %289 }
 0x144   : > { %v294_v2 = vadd.f32 %v290_v31, %v284_v30  ;;  %v2320_v31 = vmul.f32 -0.60714287, %v2213_v28 }
 0x146   : > { %1235 = vrot.lane.b32.xlu0 %v2141_v46, %s1695_s15  ;;  %1251 = vrot.lane.b32.xlu1 %v2176_v17, %s1695_s15  ;;  %v929_v46 = vrot.slane %v2239_v59, 1  ;;  %v2259_v17 = vmul.f32 0.25, %v405_v36 }
 0x147   : > { %v392_v13 = vpop.permute.xlu0 %391 }
 0x148   : > { %v396_v63 = vadd.f32 %v392_v13, %v388_v35 }
 0x14b   : > { %v2268_v6 = vpop.permute.xlu0 %483 }
 0x14f   : > { %v588_v36 = vpop.permute.xlu0 %587 }
 0x153   : > { %v300_v38 = vpop.permute.xlu0 %299 }
 0x154   : > { %v304_v30 = vadd.f32 %v300_v38, %v294_v2 }
 0x156   : > { %v926_v50 = vmul.f32 0.25, %v304_v30  ;;  %v2330_v32 = vmul.f32 -0.05, %v304_v30  ;;  %v2332_v44 = vmul.f32 0.5, %v304_v30  ;;  %v1062_v60 = vmul.f32 0.2607143, %v304_v30 }
 0x157   : > { %v1092_v5 = vmul.f32 -0.010714286, %v304_v30  ;;  %v1144_v26 = vmul.f32 0.05357143, %v304_v30  ;;  %v1162_v2 = vmul.f32 -0.60714287, %v304_v30  ;;  %v402_v38 = vpop.permute.xlu0 %401 }
 0x158   : > { %v930_v33 = vrot.slane %v926_v50, 1  ;;  %v944_v29 = vrot.slane %v926_v50, 2  ;;  %v999_v3 = vrot.slane %v2332_v44, 1  ;;  %v1017_v8 = vrot.slane %v2330_v32, 2 }
 0x159   : > { %v1066_v22 = vrot.slane %v1062_v60, 1  ;;  %v1080_v28 = vrot.slane %v1062_v60, 2  ;;  %v1096_v12 = vrot.slane %v1092_v5, 3  ;;  %v1148_v34 = vrot.slane %v1144_v26, 1 }
 0x15a   : > { %v931_v48 = vsel %vm616_vm0, %v929_v46, %v930_v33  ;;  %v2342_v13 = vsel %vm631_vm1, %v943_v11, %v944_v29  ;;  %v1000_v35 = vsel %vm616_vm0, %v998_v1, %v999_v3  ;;  %v2354_v5 = vsel %vm631_vm1, %v1016_v20, %v1017_v8 }
 0x15b   : > { %v2357_v46 = vadd.f32 %v931_v48, %v2298_v41  ;;  %v2360_v59 = vadd.f32 %v1000_v35, %v2205_v0  ;;  %v2613_v11 = vrot.slane %v2248_v43, 1  ;;  %v2368_v1 = vsel %vm631_vm1, %v2614_v55, %v1080_v28  ;;  %v494_v60 = vpop.permute.xlu0 %493 }
 0x15c   : > { %v2615_v20 = vrot.slane %v2195_v61, 3  ;;  %v2616_v0 = vrot.slane %v2252_v45, 1  ;;  %v1166_v33 = vrot.slane %v1162_v2, 2  ;;  %v1176_v29 = vrot.slane %v1144_v26, 3 }
 0x15d   : > { %v1067_v50 = vsel %vm616_vm0, %v2613_v11, %v1066_v22  ;;  %v406_v28 = vadd.f32 %v402_v38, %v396_v63  ;;  %v592_v35 = vadd.f32 %v588_v36, %v584_v27  ;;  %v2620_v61 = vrot.slane %v2259_v17, 2 }
 0x15e   : > { %v2371_v47 = vadd.f32 %v1067_v50, %v2209_v19  ;;  %v2376_v48 = vsel %vm784_vm2, %v2615_v20, %v1096_v12  ;;  %v1149_v30 = vsel %vm616_vm0, %v2616_v0, %v1148_v34  ;;  %v488_v19 = vadd.f32 %v2268_v6, %v2256_v14 }
 0x15f   : > { %v2383_v43 = vadd.f32 %v1149_v30, %v2303_v58  ;;  %v2617_v12 = vrot.slane %v2254_v49, 2  ;;  %v2618_v34 = vrot.slane %v2252_v45, 3  ;;  %v958_v50 = vmul.f32 0.25, %v406_v28  ;;  %v596_v63 = vpop.permute.xlu0 %595 }
 0x160   : > { %v2398_v55 = vmul.f32 -0.05, %v406_v28  ;;  %v2400_v26 = vmul.f32 0.5, %v406_v28  ;;  %v1104_v14 = vmul.f32 0.2607143, %v406_v28  ;;  %v498_v36 = vadd.f32 %v494_v60, %v488_v19 }
 0x161   : > { %v2391_v11 = vsel %vm631_vm1, %v2617_v12, %v1166_v33  ;;  %v2396_v2 = vsel %vm784_vm2, %v2618_v34, %v1176_v29  ;;  %v1134_v6 = vmul.f32 -0.010714286, %v406_v28  ;;  %v1190_v38 = vmul.f32 0.05357143, %v406_v28 }
 0x162   : > { %v962_v27 = vrot.slane %v958_v50, 1  ;;  %v976_v49 = vrot.slane %v958_v50, 2  ;;  %v2611_v20 = vrot.slane %v2400_v26, 1  ;;  %v2610_v0 = vrot.slane %v2398_v55, 2 }
 0x163   : > { %v1108_v45 = vrot.slane %v1104_v14, 1  ;;  %v1122_v30 = vrot.slane %v1104_v14, 2  ;;  %v1138_v33 = vrot.slane %v1134_v6, 3  ;;  %v1194_v29 = vrot.slane %v1190_v38, 1  ;;  %v504_v6 = vpop.permute.xlu0 %503 }
 0x164   : > { %v2619_v12 = vrot.slane %v2259_v17, 1  ;;  %v2410_v22 = vsel %vm631_vm1, %v2620_v61, %v976_v49  ;;  %v2621_v60 = vrot.slane %v2261_v42, 1  ;;  %v2622_v50 = vrot.slane %v2211_v37, 2 }
 0x165   : > { %v2623_v61 = vrot.slane %v2266_v24, 1  ;;  %v2624_v49 = vrot.slane %v2266_v24, 2 }
 0x166   : > { %v963_v34 = vsel %vm616_vm0, %v2619_v12, %v962_v27  ;;  %v1035_v19 = vsel %vm616_vm0, %v2621_v60, %v2611_v20  ;;  %v2422_v14 = vsel %vm631_vm1, %v2622_v50, %v2610_v0  ;;  %v2625_v60 = vrot.slane %v2215_v56, 3 }
 0x167   : > { %v2425_v27 = vadd.f32 %v963_v34, %v2317_v21  ;;  %v2428_v17 = vadd.f32 %v1035_v19, %v2225_v57  ;;  %v1109_v42 = vsel %vm616_vm0, %v2623_v61, %v1108_v45  ;;  %v2436_v12 = vsel %vm631_vm1, %v2624_v49, %v1122_v30 }
 0x168   : > { %v2439_v37 = vadd.f32 %v1109_v42, %v2229_v15  ;;  %v2444_v34 = vsel %vm784_vm2, %v2625_v60, %v1138_v33  ;;  %v2626_v57 = vrot.slane %v2273_v39, 1  ;;  %v1208_v50 = vmul.f32 -0.60714287, %v406_v28 }
 0x169   : > { %v1222_v30 = vrot.slane %v1190_v38, 3  ;;  %v508_v61 = vadd.f32 %v504_v6, %v498_v36  ;;  %v600_v49 = vadd.f32 %v596_v63, %v592_v35  ;;  %v2627_v33 = vrot.slane %v2273_v39, 3 }
 0x16a   : > { %v1195_v19 = vsel %vm616_vm0, %v2626_v57, %v1194_v29  ;;  %v1212_v56 = vrot.slane %v1208_v50, 2  ;;  %v2628_v0 = vrot.slane %v2278_v23, 2  ;;  %v2629_v45 = vrot.slane %v2284_v54, 1 }
 0x16b   : > { %v2451_v24 = vadd.f32 %v1195_v19, %v2325_v18  ;;  %v2458_v60 = vsel %vm784_vm2, %v2627_v33, %v1222_v30  ;;  %v935_v29 = vmul.f32 0.5, %v508_v61  ;;  %v948_v28 = vmul.f32 -0.05, %v508_v61 }
 0x16c   : > { %v991_v57 = vmul.f32 0.25, %v508_v61  ;;  %v2463_v19 = vsel %vm631_vm1, %v2628_v0, %v1212_v56  ;;  %v1071_v38 = vmul.f32 -0.60714287, %v508_v61  ;;  %v1084_v36 = vmul.f32 0.05357143, %v508_v61 }
 0x16d   : > { %v1153_v6 = vmul.f32 0.2607143, %v508_v61  ;;  %v939_v15 = vrot.slane %v935_v29, 1  ;;  %v952_v42 = vrot.slane %v948_v28, 2  ;;  %v2630_v23 = vrot.slane %v2298_v41, 2 }
 0x16e   : > { %v993_v35 = vadd.f32 %v991_v57, %v2330_v32  ;;  %v1008_v63 = vrot.slane %v991_v57, 1  ;;  %v1075_v39 = vrot.slane %v1071_v38, 1  ;;  %v1088_v50 = vrot.slane %v1084_v36, 2 }
 0x16f   : > { %v1157_v30 = vrot.slane %v1153_v6, 1  ;;  %v1171_v33 = vrot.slane %v1153_v6, 2  ;;  %v940_v20 = vsel %vm616_vm0, %v2629_v45, %v939_v15  ;;  %v953_v0 = vsel %vm631_vm1, %v2630_v23, %v952_v42  ;;  %v606_v15 = vpop.permute.xlu0 %605 }
 0x170   : > { %v1004_v56 = vadd.f32 %v999_v3, %v993_v35  ;;  %v2631_v29 = vrot.slane %v2198_v52, 1  ;;  %v942_v57 = vadd.f32 %v940_v20, %v2357_v46  ;;  %v2632_v36 = vrot.slane %v2289_v51, 1 }
 0x171   : > { %v2633_v45 = vrot.slane %v2201_v25, 2  ;;  %v2634_v52 = vrot.slane %v2292_v62, 1  ;;  %v2635_v46 = vrot.slane %v2292_v62, 2  ;;  %v1180_v6 = vmul.f32 -0.010714286, %v508_v61 }
 0x172   : > { %v1009_v28 = vsel %vm616_vm0, %v2631_v29, %v1008_v63  ;;  %v1076_v54 = vsel %vm616_vm0, %v2632_v36, %v1075_v39  ;;  %v1013_v42 = vadd.f32 %v1008_v63, %v1004_v56  ;;  %v947_v51 = vadd.f32 %v2342_v13, %v942_v57 }
 0x173   : > { %v1012_v38 = vadd.f32 %v1009_v28, %v2360_v59  ;;  %v1089_v41 = vsel %vm631_vm1, %v2633_v45, %v1088_v50  ;;  %v1078_v44 = vadd.f32 %v1076_v54, %v2371_v47  ;;  %v1158_v3 = vsel %vm616_vm0, %v2634_v52, %v1157_v30 }
 0x174   : > { %v1172_v59 = vsel %vm631_vm1, %v2635_v46, %v1171_v33  ;;  %v1160_v25 = vadd.f32 %v1158_v3, %v2383_v43  ;;  %v1216_v35 = vrot.slane %v2328_v40, 2  ;;  %v1022_v47 = vadd.f32 %v1017_v8, %v1013_v42 }
 0x175   : > { %v1021_v20 = vadd.f32 %v2354_v5, %v1012_v38  ;;  %v1083_v63 = vadd.f32 %v2368_v1, %v1078_v44  ;;  %v610_v39 = vadd.f32 %v606_v15, %v600_v49  ;;  %v2499_v50 = vadd.f32 %v953_v0, %v947_v51 }
 0x176   : > { %v1169_v62 = vadd.f32 %v2391_v11, %v1160_v25  ;;  %v1184_v30 = vrot.slane %v1180_v6, 3  ;;  %v1321_v23 = vrot.slane %v1022_v47, 1  ;;  %v2636_v61 = vrot.slane %v2303_v58, 3 }
 0x177   : > { %v1320_v33 = vrot.slane %v1021_v20, 1  ;;  %v1091_v13 = vadd.f32 %v1089_v41, %v1083_v63  ;;  %v967_v5 = vmul.f32 0.5, %v610_v39  ;;  %v980_v56 = vmul.f32 -0.05, %v610_v39 }
 0x178   : > { %v1174_v43 = vadd.f32 %v1172_v59, %v1169_v62  ;;  %v1185_v29 = vsel %vm784_vm2, %v2636_v61, %v1184_v30  ;;  %v1026_v32 = vmul.f32 0.25, %v610_v39  ;;  %v1113_v8 = vmul.f32 -0.60714287, %v610_v39 }
 0x179   : > { %v2506_v1 = vadd.f32 %v2376_v48, %v1091_v13  ;;  %v1322_v49 = vsel %vm616_vm0, %v1320_v33, %v1321_v23  ;;  %v971_v0 = vrot.slane %v967_v5, 1  ;;  %v984_v11 = vrot.slane %v980_v56, 2 }
 0x17a   : > { %v1179_v28 = vadd.f32 %v2396_v2, %v1174_v43  ;;  %v1028_v57 = vadd.f32 %v1026_v32, %v2398_v55  ;;  %v1043_v38 = vrot.slane %v1026_v32, 1  ;;  %v1117_v36 = vrot.slane %v1113_v8, 1 }
 0x17b   : > { %v2637_v54 = vrot.slane %v2306_v4, 1  ;;  %v2638_v45 = vrot.slane %v2317_v21, 2  ;;  %v1126_v48 = vmul.f32 0.05357143, %v610_v39  ;;  %v1199_v15 = vmul.f32 0.2607143, %v610_v39 }
 0x17c   : > { %v1187_v42 = vadd.f32 %v1185_v29, %v1179_v28  ;;  %v2639_v52 = vrot.slane %v2400_v26, 1  ;;  %v2640_v3 = vrot.slane %v2218_v7, 1  ;;  %v2641_v59 = vrot.slane %v2320_v31, 1 }
 0x17d   : > { %v972_v58 = vsel %vm616_vm0, %v2637_v54, %v971_v0  ;;  %v985_v41 = vsel %vm631_vm1, %v2638_v45, %v984_v11  ;;  %v1130_v51 = vrot.slane %v1126_v48, 2  ;;  %v1203_v20 = vrot.slane %v1199_v15, 1 }
 0x17e   : > { %v974_v44 = vadd.f32 %v972_v58, %v2425_v27  ;;  %v1039_v2 = vadd.f32 %v2639_v52, %v1028_v57  ;;  %v1044_v46 = vsel %vm616_vm0, %v2640_v3, %v1043_v38  ;;  %v1118_v21 = vsel %vm616_vm0, %v2641_v59, %v1117_v36 }
 0x17f   : > { %v1047_v4 = vadd.f32 %v1044_v46, %v2428_v17  ;;  %v1120_v27 = vadd.f32 %v1118_v21, %v2439_v37  ;;  %v1217_v47 = vrot.slane %v1199_v15, 2  ;;  %v2642_v7 = vrot.slane %v2221_v53, 2 }
 0x180   : > { %v979_v25 = vadd.f32 %v2410_v22, %v974_v44  ;;  %v1048_v6 = vadd.f32 %v1043_v38, %v1039_v2  ;;  %v2643_v17 = vrot.slane %v2328_v40, 1  ;;  %v1226_v62 = vmul.f32 -0.010714286, %v610_v39 }
 0x181   : > { %v1056_v26 = vadd.f32 %v2422_v14, %v1047_v4  ;;  %v1131_v63 = vsel %vm631_vm1, %v2642_v7, %v1130_v51  ;;  %v2644_v33 = vrot.slane %v2398_v55, 2  ;;  %v1125_v22 = vadd.f32 %v2436_v12, %v1120_v27 }
 0x182   : > { %v1204_v31 = vsel %vm616_vm0, %v2643_v17, %v1203_v20  ;;  %v987_v30 = vadd.f32 %v985_v41, %v979_v25  ;;  %v1229_v23 = vrot.slane %v2325_v18, 3  ;;  %v1218_v14 = vsel %vm631_vm1, %v1216_v35, %v1217_v47 }
 0x183   : > { %v1057_v13 = vadd.f32 %v2644_v33, %v1048_v6  ;;  %v1206_v37 = vadd.f32 %v1204_v31, %v2451_v24  ;;  %v1230_v53 = vrot.slane %v1226_v62, 3  ;;  %v1312_v5 = vrot.slane %v1056_v26, 1 }
 0x184   : > { %v1133_v56 = vadd.f32 %v1131_v63, %v1125_v22  ;;  %v1324_v61 = vadd.f32 %v1322_v49, %v987_v30  ;;  %v1328_v29 = vsub.f32 %v987_v30, %v1322_v49 }
 0x185   : > { %v1215_v40 = vadd.f32 %v2463_v19, %v1206_v37  ;;  %v1313_v43 = vrot.slane %v1057_v13, 1  ;;  %v1231_v39 = vsel %vm784_vm2, %v1229_v23, %v1230_v53 }
 0x186   : > { %v1141_v55 = vadd.f32 %v2444_v34, %v1133_v56  ;;  %v1325_v18 = vmul.f32 0.70710677, %v1324_v61  ;;  %v1329_v8 = vmul.f32 0.70710677, %v1328_v29 }
 0x187   : > { %v1220_v32 = vadd.f32 %v1218_v14, %v1215_v40  ;;  %v1314_v12 = vsel %vm616_vm0, %v1312_v5, %v1313_v43 }
 0x188   : > { %v1316_v24 = vsub.f32 %v2499_v50, %v1314_v12  ;;  %v1326_v35 = vadd.f32 %v1314_v12, %v2499_v50  ;;  %v1360_v11 = vadd.f32 %v1187_v42, %v1141_v55  ;;  %v1364_v19 = vsub.f32 %v1141_v55, %v1187_v42 }
 0x189   : > { %v1225_v0 = vadd.f32 %v2458_v60, %v1220_v32  ;;  %v1331_v49 = vmul.f32 %v1325_v18, %v1325_v18  ;;  %v1345_v34 = vmul.f32 %v1329_v8, %v1329_v8 }
 0x18a   : > { %v1317_v28 = vmul.f32 0.70710677, %v1316_v24  ;;  %v1327_v57 = vmul.f32 0.70710677, %v1326_v35  ;;  %v1361_v45 = vmul.f32 0.70710677, %v1360_v11 }
 0x18b   : > { %v1233_v38 = vadd.f32 %v1231_v39, %v1225_v0  ;;  %v1365_v48 = vmul.f32 0.70710677, %v1364_v19  ;;  %v1260_v39 = vpop.permute.xlu1 %1259 }
 0x18c   : > { %v1330_v36 = vmul.f32 %v1317_v28, %v1317_v28  ;;  %v1344_v54 = vmul.f32 %v1327_v57, %v1327_v57  ;;  %v1367_v3 = vmul.f32 %v1361_v45, %v1361_v45  ;;  %v1262_v29 = vsub.f32 %v2042_v9, %v1260_v39 }
 0x18d   : > { %v1358_v58 = vsub.f32 %v2506_v1, %v1233_v38  ;;  %v1362_v41 = vadd.f32 %v1233_v38, %v2506_v1  ;;  %v1381_v4 = vmul.f32 %v1365_v48, %v1365_v48  ;;  %v1270_v55 = vadd.f32 %v1260_v39, %v2042_v9 }
 0x18e   : > { %v1332_v15 = vadd.f32 %v1331_v49, %v1330_v36  ;;  %v1346_v50 = vadd.f32 %v1345_v34, %v1344_v54  ;;  %v1263_v32 = vmul.f32 0.70710677, %v1262_v29 }
 0x18f   : > { %v1359_v44 = vmul.f32 0.70710677, %v1358_v58  ;;  %v1363_v52 = vmul.f32 0.70710677, %v1362_v41  ;;  %v1271_v12 = vmul.f32 0.70710677, %v1270_v55 }
 0x190   : > { %v1333_v60 = vadd.f32 0.0001, %v1332_v15  ;;  %v1347_v42 = vadd.f32 0.0001, %v1346_v50  ;;  %v1274_v18 = vmul.f32 %v1263_v32, %v1263_v32 }
 0x191   : > { %v1366_v2 = vmul.f32 %v1359_v44, %v1359_v44  ;;  %v1380_v46 = vmul.f32 %v1363_v52, %v1363_v52  ;;  %v1292_v24 = vmul.f32 %v1271_v12, %v1271_v12 }
 0x192   : > { %1627 = vrsqrt.f32 %v1333_v60  ;;  %vm1336_vm3 = vcmp.eq.f32.partialorder %v1333_v60, inf  ;;  %v1339_v27 = vand.u32 2147483648, %v1333_v60  ;;  %vm1338_vm4 = vcmp.eq.f32.partialorder %v1333_v60, 0.0 }
 0x193   : > { %1629 = vrsqrt.f32 %v1347_v42  ;;  %v1368_v59 = vadd.f32 %v1367_v3, %v1366_v2  ;;  %v1382_v21 = vadd.f32 %v1381_v4, %v1380_v46  ;;  %vm1350_vm5 = vcmp.eq.f32.partialorder %v1347_v42, inf }
 0x194   : > { %v1353_v7 = vand.u32 2147483648, %v1347_v42  ;;  %vm1352_vm7 = vcmp.eq.f32.partialorder %v1347_v42, 0.0 }
 0x195   : > { %v1369_v51 = vadd.f32 0.0001, %v1368_v59  ;;  %v1383_v20 = vadd.f32 0.0001, %v1382_v21 }
 0x197   : > { %1631 = vrsqrt.f32 %v1369_v51  ;;  %vm1372_vm8 = vcmp.eq.f32.partialorder %v1369_v51, inf  ;;  %v1375_v37 = vand.u32 2147483648, %v1369_v51  ;;  %vm1374_vm9 = vcmp.eq.f32.partialorder %v1369_v51, 0.0 }
 0x198   : > { %1633 = vrsqrt.f32 %v1383_v20  ;;  %vm1386_vm10 = vcmp.eq.f32.partialorder %v1383_v20, inf  ;;  %v1389_v53 = vand.u32 2147483648, %v1383_v20  ;;  %vm1388_vm11 = vcmp.eq.f32.partialorder %v1383_v20, 0.0 }
 0x19c   : > { %v1628_v1 = vpop.eup %1627 }
 0x19d   : > { %v1630_v25 = vpop.eup %1629  ;;  %v1335_v6 = vmul.f32 %v1628_v1, %v1333_v60 }
 0x19e   : > { %v1349_v47 = vmul.f32 %v1630_v25, %v1347_v42 }
 0x19f   : > { %v1337_v26 = vsel %vm1336_vm3, %v1333_v60, %v1335_v6 }
 0x1a0   : > { %v1340_v63 = vsel %vm1338_vm4, %v1339_v27, %v1337_v26  ;;  %v1351_v17 = vsel %vm1350_vm5, %v1347_v42, %v1349_v47 }
 0x1a1   : > { %v1632_v31 = vpop.eup %1631  ;;  %v1554_v62 = vadd.f32 -0.01, %v1340_v63  ;;  %v1354_v30 = vsel %vm1352_vm7, %v1353_v7, %v1351_v17 }
 0x1a2   : > { %v1634_v33 = vpop.eup %1633  ;;  %v1556_v13 = vadd.f32 -0.01, %v1354_v30  ;;  %v1371_v22 = vmul.f32 %v1632_v31, %v1369_v51 }
 0x1a3   : > { %1555 = vst.msk [vmem:[%s2553_s6 + $0x18] sm:$0xff] %vm1256_vm6, %v1554_v62  ;;  %v1385_v23 = vmul.f32 %v1634_v33, %v1383_v20 }
 0x1a4   : > { %1557 = vst.msk [vmem:[%s2553_s6 + $0x20] sm:$0xff] %vm1256_vm6, %v1556_v13  ;;  %v1373_v14 = vsel %vm1372_vm8, %v1369_v51, %v1371_v22 }
 0x1a5   : > { %v1376_v5 = vsel %vm1374_vm9, %v1375_v37, %v1373_v14  ;;  %v1387_v56 = vsel %vm1386_vm10, %v1383_v20, %v1385_v23 }
 0x1a6   : > { %v1558_v40 = vadd.f32 -0.01, %v1376_v5  ;;  %v1390_v43 = vsel %vm1388_vm11, %v1389_v53, %v1387_v56 }
 0x1a7   : > { %v1560_v61 = vadd.f32 -0.01, %v1390_v43 }
 0x1a8   : > { %1559 = vst.msk [vmem:[%s2553_s6 + $0x10] sm:$0xff] %vm1256_vm6, %v1558_v40 }
 0x1a9   : > { %1561 = vst.msk [vmem:[%s2553_s6 + $0x28] sm:$0xff] %vm1256_vm6, %v1560_v61 }
 0x1aa   : > { %v1450_v46 = vld [vmem:[%s2553_s6 + $0x18] sm:$0xff] (%p1757_p6) }
 0x1ab   : > { %v1452_v4 = vld [vmem:[%s2553_s6 + $0x20] sm:$0xff] (%p1757_p6)  ;;  %1451 = vst [vmem:[%s1404_s26 + $0x60] sm:$0xff] (%p1757_p6), %v1450_v46 }
 0x1ac   : > { %1453 = vst [vmem:[%s1404_s26 + $0x80] sm:$0xff] (%p1757_p6), %v1452_v4 }
 0x1af   : > { %v1448_v3 = vld [vmem:[%s2553_s6 + $0x10] sm:$0xff] (%p1757_p6) }
 0x1b0   : > { %v1454_v59 = vld [vmem:[%s2553_s6 + $0x28] sm:$0xff] (%p1757_p6)  ;;  %1449 = vst [vmem:[%s1404_s26 + $0x40] sm:$0xff] (%p1757_p6), %v1448_v3 }
 0x1b1   : > { %1455 = vst [vmem:[%s1404_s26 + $0xa0] sm:$0xff] (%p1757_p6), %v1454_v59 }
 0x1b4   : > { %v1296_v35 = vpop.permute.xlu1 %1295  ;;  %v1278_v8 = vpop.permute.xlu0 %1277 }
 0x1b5   : > { %v1298_v0 = vadd.f32 %v1296_v35, %v1292_v24  ;;  %v1280_v11 = vadd.f32 %v1278_v8, %v1274_v18 }
 0x1b7   : > { %v1299_v19 = vadd.f32 0.0001, %v1298_v0  ;;  %v1281_v28 = vadd.f32 0.0001, %v1280_v11 }
 0x1b8   : > { %v1236_v57 = vpop.permute.xlu0 %1235  ;;  %v1252_v49 = vpop.permute.xlu1 %1251 }
 0x1b9   : > { %1635 = vrsqrt.f32 %v1299_v19  ;;  %v1238_v38 = vadd.f32 %v1236_v57, %v2154_v10  ;;  %vm1302_vm12 = vcmp.eq.f32.partialorder %v1299_v19, inf  ;;  %v1305_v41 = vand.u32 2147483648, %v1299_v19 }
 0x1ba   : > { %1637 = vrsqrt.f32 %v1281_v28  ;;  %vm1304_vm13 = vcmp.eq.f32.partialorder %v1299_v19, 0.0  ;;  %vm1284_vm14 = vcmp.eq.f32.partialorder %v1281_v28, inf  ;;  %v1287_v50 = vand.u32 2147483648, %v1281_v28 }
 0x1bb   : > { %v1245_v36 = vadd.f32 %v2183_v16, %v1238_v38  ;;  %vm1286_vm15 = vcmp.eq.f32.partialorder %v1281_v28, 0.0 }
 0x1bd   : > { %v1254_v9 = vadd.f32 %v1252_v49, %v1245_v36 }
 0x1bf   : > { %v1255_v54 = vmul.f32 0.25, %v1254_v9 }
 0x1c1   : > { %1257 = vst.msk [vmem:[%s2553_s6] sm:$0xff] %vm1256_vm6, %v1255_v54 }
 0x1c3   : > { %v1636_v34 = vpop.eup %1635 }
 0x1c4   : > { %v1638_v58 = vpop.eup %1637  ;;  %v1301_v45 = vmul.f32 %v1636_v34, %v1299_v19 }
 0x1c5   : > { %v1283_v48 = vmul.f32 %v1638_v58, %v1281_v28  ;;  %1400 = sbr.rel (!%p1757_p6) target bundleno = 468 (0x1d4), region = 66 }
 0x1c6   : > { %v1303_v15 = vsel %vm1302_vm12, %v1299_v19, %v1301_v45 }
 0x1c7   : > { %v1306_v10 = vsel %vm1304_vm13, %v1305_v41, %v1303_v15  ;;  %v1285_v44 = vsel %vm1284_vm14, %v1281_v28, %v1283_v48 }
 0x1c8   : > { %v1552_v16 = vadd.f32 -0.01, %v1306_v10  ;;  %v1288_v52 = vsel %vm1286_vm15, %v1287_v50, %v1285_v44  ;;  %v1444_v42 = vld [vmem:[%s2553_s6] sm:$0xff] (%p1757_p6) }
 0x1c9   : > { %v1550_v60 = vadd.f32 -0.01, %v1288_v52  ;;  %1445 = vst [vmem:[%s1404_s26] sm:$0xff] (%p1757_p6), %v1444_v42 }
 0x1ca   : > { %1553 = vst.msk [vmem:[%s2553_s6 + $0x30] sm:$0xff] %vm1256_vm6, %v1552_v16 }
 0x1cb   : > { %1551 = vst.msk [vmem:[%s2553_s6 + $0x8] sm:$0xff] %vm1256_vm6, %v1550_v60 }
 0x1d1   : > { %v1456_v21 = vld [vmem:[%s2553_s6 + $0x30] sm:$0xff] }
 0x1d2   : > { %v1446_v2 = vld [vmem:[%s2553_s6 + $0x8] sm:$0xff]  ;;  %1457 = vst [vmem:[%s1404_s26 + $0xc0] sm:$0xff] %v1456_v21 }
 0x1d3   : > { %1447 = vst [vmem:[%s1404_s26 + $0x20] sm:$0xff] %v1446_v2 }
 0x1d4 PF: > { %s11_s12 = sadd.s32 1, %s1693_s12   ;;  %s2645_s6 = smov %s1673_s7 }
 0x1d5   : > { %p8_p12 = scmp.ge.s32.totalorder %s11_s12, 10   ;;  %s2646_s7 = smov %s1765_s21 }
 0x1d6   : > { %s2647_s8 = smov %s1685_s10  ;;  %s2648_s9 = smov %s1689_s11 }
 0x1d7   : > { %s2649_s10 = smov %s2652_s13  ;;  %s2650_s11 = smov %s2656_s14 }
 0x1d8   :  { %10 = sbr.rel (!%p8_p12) target bundleno = 4 (0x4), region = 144 }

</bundles_post_ra>
